<compile_context>
chip_gen: v7x
topology: tpu7x:2x2x1
jax: 0.10.0
libtpu: 0.0.40
codegen_flags: <defaults>
</compile_context>

<pallas_src>
import math
import numpy as np
import jax
import jax.numpy as jnp
from jax.experimental import pallas as pl
from jax.experimental.pallas import tpu as pltpu

# ---- module hyper-parameters (emb(num_spherical, num_radial, cutoff, envelope_exponent)) ----
NUM_SPHERICAL = 3          # analytic tables below are built for num_spherical == 3
NUM_RADIAL = 6
CUTOFF = 5.0
ENVELOPE_EXPONENT = 5
PI = math.pi

# combined-constant-table column layout (per row r = l*NUM_RADIAL + j)
_C_ZERO = 0        # Bessel zero z_{l,j}
_C_A = 1           # norm*A1..A3  (coeffs of u^-1..u^-3 multiplying sin u)
_C_B = 4           # norm*B1..B3  (coeffs of u^-1..u^-3 multiplying cos u)
_C_ASPH = 7        # Y_l^0 polynomial coeffs in cos(theta): c0, c1, c2
_C_TOR = 10        # 3 torsion slots (b = out column % 3) x 8 coeffs each
_TBL_COLS = _C_TOR + 8 * NUM_SPHERICAL      # = 34


# =====================  host-side constant-table construction (numpy)  =====================

def _sph_j(l, x):
    """Analytic spherical Bessel j_l, l <= 3."""
    x = np.asarray(x, dtype=np.float64)
    s, c = np.sin(x), np.cos(x)
    if l == 0:
        return s / x
    if l == 1:
        return s / x ** 2 - c / x
    if l == 2:
        return (3.0 / x ** 3 - 1.0 / x) * s - 3.0 / x ** 2 * c
    if l == 3:
        return (15.0 / x ** 4 - 6.0 / x ** 2) * s - (15.0 / x ** 3 - 1.0 / x) * c
    raise NotImplementedError(l)


def _bessel_zeros(n, k):
    """First k zeros of j_l for l=0..n-1 (interlacing bisection; mirrors DimeNet Jn_zeros)."""
    nz = k + n - 1
    zeros = np.zeros((n, nz))
    zeros[0, :] = np.arange(1, nz + 1) * PI
    pts = zeros[0, :].copy()
    for l in range(1, n):
        new = np.zeros(nz)
        for j in range(nz - l):
            lo, hi = pts[j], pts[j + 1]
            flo = _sph_j(l, lo)
            for _ in range(200):
                mid = 0.5 * (lo + hi)
                fm = _sph_j(l, mid)
                if np.sign(fm) == np.sign(flo):
                    lo, flo = mid, fm
                else:
                    hi = mid
            new[j] = 0.5 * (lo + hi)
        pts = new
        zeros[l, :] = new
    return zeros[:, :k]


# j_l(u) = (sum_p A_p u^-p) sin(u) + (sum_p B_p u^-p) cos(u), p = 1..3
_BESSEL_A = {0: [1.0, 0.0, 0.0], 1: [0.0, 1.0, 0.0], 2: [-1.0, 0.0, 3.0]}
_BESSEL_B = {0: [0.0, 0.0, 0.0], 1: [-1.0, 0.0, 0.0], 2: [0.0, -3.0, 0.0]}


def _pref(l, m):
    return math.sqrt((2 * l + 1) * math.factorial(l - abs(m)) /
                     (4.0 * math.pi * math.factorial(l + abs(m))))


def _y_l0_polys():
    """Y_l^0(theta) as polynomials in cos(theta) (DimeNet real_sph_harm, zero_m_only)."""
    return np.array([
        [_pref(0, 0), 0.0, 0.0],
        [0.0, _pref(1, 0), 0.0],
        [-0.5 * _pref(2, 0), 0.0, 1.5 * _pref(2, 0)],
    ])


def _real_sph_entries():
    """Real spherical harmonics in the exact concatenation order used by torsion_emb
    (per l: m = 0, +1..+l, -l..-1). Entry = (poly in cos(theta), |m|, cos-sel, sin-sel);
    value = poly(cos th) * sin(th)^|m| * {cos,sin}(|m| phi)."""
    r2 = math.sqrt(2.0)
    ent = []
    # l = 0
    ent.append(([_pref(0, 0), 0.0, 0.0], 0, 1.0, 0.0))
    # l = 1 : m = 0, +1, -1
    ent.append(([0.0, _pref(1, 0), 0.0], 0, 1.0, 0.0))
    ent.append(([-r2 * _pref(1, 1), 0.0, 0.0], 1, 1.0, 0.0))
    ent.append(([-r2 * _pref(1, 1), 0.0, 0.0], 1, 0.0, 1.0))
    # l = 2 : m = 0, +1, +2, -2, -1
    ent.append(([-0.5 * _pref(2, 0), 0.0, 1.5 * _pref(2, 0)], 0, 1.0, 0.0))
    ent.append(([0.0, -3.0 * r2 * _pref(2, 1), 0.0], 1, 1.0, 0.0))
    ent.append(([3.0 * r2 * _pref(2, 2), 0.0, 0.0], 2, 1.0, 0.0))
    ent.append(([3.0 * r2 * _pref(2, 2), 0.0, 0.0], 2, 0.0, 1.0))
    ent.append(([0.0, -3.0 * r2 * _pref(2, 1), 0.0], 1, 0.0, 1.0))
    return ent


def init_params():
    """Deterministic constant table for the fused angle/torsion kernel (matches
    module __init__ + reset_parameters; the dist_emb freqs j*pi are baked into the kernel).

    Returns tbl [18, 34] float32; per row r = l*6 + j (see _C_* column layout above)."""
    assert NUM_SPHERICAL == 3, "analytic tables are built for num_spherical == 3"
    n, k = NUM_SPHERICAL, NUM_RADIAL
    zeros = _bessel_zeros(n, k)
    tbl = np.zeros((n * k, _TBL_COLS))
    for l in range(n):
        for j in range(k):
            r = l * k + j
            z = zeros[l, j]
            norm = 1.0 / np.sqrt(0.5 * _sph_j(l + 1, z) ** 2)
            tbl[r, _C_ZERO] = z
            tbl[r, _C_A:_C_A + 3] = norm * np.asarray(_BESSEL_A[l])   # norm folded in
            tbl[r, _C_B:_C_B + 3] = norm * np.asarray(_BESSEL_B[l])
    y0 = _y_l0_polys()
    for l in range(n):
        tbl[l * k:(l + 1) * k, _C_ASPH:_C_ASPH + 3] = y0[l]
    ent = _real_sph_entries()
    for l in range(n):
        for b in range(n):
            poly, mabs, cc, sc = ent[l * n + b]      # cbf column l*n + b of the original view
            col = np.zeros(8)
            col[0:3] = poly
            if mabs == 0:
                col[3] = cc
            elif mabs == 1:
                col[4], col[5] = cc, sc
            else:
                col[6], col[7] = cc, sc
            tbl[l * k:(l + 1) * k, _C_TOR + 8 * b:_C_TOR + 8 * (b + 1)] = col
    return jnp.asarray(tbl, dtype=jnp.float32)


# ==============================  Pallas kernels  ==============================

def _dist_emb_kernel(d_ref, out_ref):
    """out[j, t] = Envelope(d_t) * sin((j+1)*pi*d_t); lane axis = edges (lane-dense).
    sin((j+1)x) built by Chebyshev recurrence from one sin/cos pair (1-wide EUP relief)."""
    p = ENVELOPE_EXPONENT + 1
    ea = -(p + 1) * (p + 2) / 2.0
    eb = float(p * (p + 2))
    ec = -p * (p + 1) / 2.0
    d = d_ref[...] * (1.0 / CUTOFF)                   # [1, L]
    d2 = d * d
    d4 = d2 * d2
    d_p0 = d4 * d                                     # d^(p-1)
    d_p1 = d_p0 * d
    d_p2 = d_p1 * d
    env = 1.0 / d + ea * d_p0 + eb * d_p1 + ec * d_p2
    env = jnp.where(d < 1.0, env, 0.0)                # no-op for valid edges (d <= cutoff)

    x = PI * d
    s_prev = jnp.zeros_like(x)                        # sin(0*x)
    s_cur = jnp.sin(x)                                # sin(1*x)
    two_c = 2.0 * jnp.cos(x)
    for j in range(NUM_RADIAL):                       # static unroll
        out_ref[j:j + 1, :] = env * s_cur
        s_next = two_c * s_cur - s_prev               # sin((j+2)x)
        s_prev, s_cur = s_cur, s_next


def _angle_torsion_kernel(dtp_ref, tbl_ref, ang_ref, tor0_ref, tor1_ref, tor2_ref):
    """Fused angle_emb + torsion_emb.
    dtp_ref rows: [dist[idx_kj], theta, phi]; sublane row of outputs = l*NUM_RADIAL + j;
    lane axis = triplets."""
    x = dtp_ref[0:1, :] * (1.0 / CUTOFF)              # [1, L]
    th = dtp_ref[1:2, :]
    phi = dtp_ref[2:3, :]

    # ---- 18 unique radial-basis rows, evaluated ONCE and shared by all four outputs ----
    z = tbl_ref[:, _C_ZERO:_C_ZERO + 1]               # [18, 1]
    u = z * x                                         # [18, L]
    r = pl.reciprocal(u, approx=True)
    inv = r * (2.0 - u * r)                           # one Newton step -> ~exact f32 1/u
    inv2 = inv * inv
    inv3 = inv2 * inv
    su = jnp.sin(u)
    cu = jnp.cos(u)
    a1 = tbl_ref[:, _C_A:_C_A + 1]
    a2 = tbl_ref[:, _C_A + 1:_C_A + 2]
    a3 = tbl_ref[:, _C_A + 2:_C_A + 3]
    b1 = tbl_ref[:, _C_B:_C_B + 1]
    b2 = tbl_ref[:, _C_B + 1:_C_B + 2]
    b3 = tbl_ref[:, _C_B + 2:_C_B + 3]
    rbf = (a1 * inv + a2 * inv2 + a3 * inv3) * su + (b1 * inv + b2 * inv2 + b3 * inv3) * cu

    # ---- shared angular pieces, kept at (1, L): broadcast happens at the multiply ----
    ct = jnp.cos(th)
    st = jnp.sin(th)
    cp = jnp.cos(phi)
    sp = jnp.sin(phi)
    ct2 = ct * ct
    st2 = st * st
    c2p = 2.0 * cp * cp - 1.0                         # cos(2*phi) via double angle
    s2p = 2.0 * sp * cp                               # sin(2*phi)
    f1c = st * cp                                     # sin(th)   * cos(phi)
    f1s = st * sp                                     # sin(th)   * sin(phi)
    f2c = st2 * c2p                                   # sin^2(th) * cos(2*phi)
    f2s = st2 * s2p                                   # sin^2(th) * sin(2*phi)

    # ---- angle_emb: rbf * Y_l^0(theta) ----
    cbf = (tbl_ref[:, _C_ASPH:_C_ASPH + 1]
           + tbl_ref[:, _C_ASPH + 1:_C_ASPH + 2] * ct
           + tbl_ref[:, _C_ASPH + 2:_C_ASPH + 3] * ct2)
    ang_ref[...] = rbf * cbf

    # ---- torsion_emb: one (18, L) group per m-slot b = output column % 3 ----
    tor_refs = (tor0_ref, tor1_ref, tor2_ref)
    for b in range(NUM_SPHERICAL):                    # static unroll
        c0 = _C_TOR + 8 * b
        poly = (tbl_ref[:, c0:c0 + 1]
                + tbl_ref[:, c0 + 1:c0 + 2] * ct
                + tbl_ref[:, c0 + 2:c0 + 3] * ct2)
        trig = (tbl_ref[:, c0 + 3:c0 + 4]
                + tbl_ref[:, c0 + 4:c0 + 5] * f1c
                + tbl_ref[:, c0 + 5:c0 + 6] * f1s
                + tbl_ref[:, c0 + 6:c0 + 7] * f2c
                + tbl_ref[:, c0 + 7:c0 + 8] * f2s)
        tor_refs[b][...] = rbf * poly * trig


# ==============================  wrapper (glue)  ==============================

def _round_up(x, m):
    return ((x + m - 1) // m) * m


def _lane_tiling(rows, tile):
    """Pick a lane tile (multiple of 128) and padded row count; keep >= 2 grid steps
    when rows allow it so both v7x TensorCores get work."""
    rows = max(int(rows), 1)
    r = _round_up(rows, 128)
    t = min(tile, r)
    if t >= r and r > 128:
        t = _round_up(r // 2, 128)
    return t, _round_up(r, t)


def _pad1d(v, total, fill=0.0):
    v = v.astype(jnp.float32)
    return jnp.pad(v, (0, total - v.shape[0]), constant_values=fill)


def emb_forward(dist, angle, torsion, idx_kj, table, tile=2048):
    """Returns (dist_emb [E,6], angle_emb [T,18], torsion_emb [T,54]) matching the module."""
    n, k = NUM_SPHERICAL, NUM_RADIAL
    E, T = dist.shape[0], angle.shape[0]
    tile = max(128, (int(tile) // 128) * 128)
    par = pltpu.CompilerParams(dimension_semantics=("parallel",))

    # ---------------- dist_emb over edges ----------------
    tE, E_pad = _lane_tiling(E, tile)
    d_lane = _pad1d(dist, E_pad, 1.0).reshape(1, E_pad)      # pad value arbitrary but nonzero
    dist_t = pl.pallas_call(
        _dist_emb_kernel,
        out_shape=jax.ShapeDtypeStruct((k, E_pad), jnp.float32),
        grid=(E_pad // tE,),
        in_specs=[pl.BlockSpec((1, tE), lambda i: (0, i))],
        out_specs=pl.BlockSpec((k, tE), lambda i: (0, i)),
        compiler_params=par,
    )(d_lane)
    dist_e = dist_t.T[:E]

    # ---------------- fused angle_emb + torsion_emb over triplets ----------------
    # The radial basis is elementwise in dist, so rbf[idx_kj] == rbf(dist[idx_kj]); the
    # tiny gather stays in plain-JAX glue and d_kj/theta/phi are packed into one input.
    tT, T_pad = _lane_tiling(T, tile)
    dtp = jnp.stack([_pad1d(dist[idx_kj], T_pad, 1.0),
                     _pad1d(angle, T_pad, 0.0),
                     _pad1d(torsion, T_pad, 0.0)], axis=0)   # [3, T_pad]
    C1 = n * k
    out_sds = jax.ShapeDtypeStruct((C1, T_pad), jnp.float32)
    ang_t, t0, t1, t2 = pl.pallas_call(
        _angle_torsion_kernel,
        out_shape=(out_sds, out_sds, out_sds, out_sds),
        grid=(T_pad // tT,),
        in_specs=[pl.BlockSpec((3, tT), lambda i: (0, i)),
                  pl.BlockSpec(table.shape, lambda i: (0, 0))],
        out_specs=(pl.BlockSpec((C1, tT), lambda i: (0, i)),) * 4,
        compiler_params=par,
    )(dtp, table)
    angle_e = ang_t.T[:T]
    # group b holds columns with out col % 3 == b; single fused stack+reshape restores
    # out[t, l*18 + j*3 + b] = group_b[l*6 + j, t]
    torsion_e = jnp.stack([t0.T, t1.T, t2.T], axis=-1).reshape(T_pad, n * k * n)[:T]
    return dist_e, angle_e, torsion_e


# ==============================  pure-numpy reference  ==============================

def _reference(dist, angle, torsion, idx_kj):
    """float64 reference reproducing the PyTorch module's formulas column by column."""
    n, k = NUM_SPHERICAL, NUM_RADIAL
    dist = np.asarray(dist, np.float64)
    theta = np.asarray(angle, np.float64)
    phi = np.asarray(torsion, np.float64)
    idx = np.asarray(idx_kj)

    d = dist / CUTOFF
    p = ENVELOPE_EXPONENT + 1
    a, b, c = -(p + 1) * (p + 2) / 2.0, float(p * (p + 2)), -p * (p + 1) / 2.0
    env = 1.0 / d + a * d ** (p - 1) + b * d ** p + c * d ** (p + 1)
    env = np.where(d < 1.0, env, 0.0)
    freq = np.arange(1, k + 1, dtype=np.float64) * PI
    dist_e = env[:, None] * np.sin(freq[None, :] * d[:, None])

    zeros = _bessel_zeros(n, k)
    dk = d[idx]
    rbf = np.zeros((idx.shape[0], n * k))
    for l in range(n):
        for j in range(k):
            nrm = 1.0 / np.sqrt(0.5 * _sph_j(l + 1, zeros[l, j]) ** 2)
            rbf[:, l * k + j] = nrm * _sph_j(l, zeros[l, j] * dk)

    y0 = _y_l0_polys()
    ct, st = np.cos(theta), np.sin(theta)
    cbf_a = np.stack([y0[l, 0] + y0[l, 1] * ct + y0[l, 2] * ct * ct for l in range(n)], axis=1)
    angle_e = (rbf.reshape(-1, n, k) * cbf_a[:, :, None]).reshape(-1, n * k)

    cbf_t = []
    for poly, mabs, cc, sc in _real_sph_entries():
        cbf_t.append((poly[0] + poly[1] * ct + poly[2] * ct * ct) * st ** mabs
                     * (cc * np.cos(mabs * phi) + sc * np.sin(mabs * phi)))
    cbf_t = np.stack(cbf_t, axis=1)                                      # [T, 9]
    torsion_e = (rbf.reshape(-1, n, k, 1) * cbf_t.reshape(-1, n, 1, n)).reshape(-1, n * k * n)
    return dist_e, angle_e, torsion_e


if __name__ == "__main__":
    key = jax.random.PRNGKey(0)
    kd, ka, kt, ki = jax.random.split(key, 4)
    E, T = 16, 32
    dist = jax.random.uniform(kd, (E,), jnp.float32, 0.5, CUTOFF - 0.1)
    angle = jax.random.uniform(ka, (T,), jnp.float32, 0.05, PI - 0.05)
    torsion = jax.random.uniform(kt, (T,), jnp.float32, 0.0, 2.0 * PI)
    idx_kj = jax.random.randint(ki, (T,), 0, E, dtype=jnp.int32)

    table = init_params()
    fwd = jax.jit(emb_forward, static_argnames=("tile",))
    de, ae, te = fwd(dist, angle, torsion, idx_kj, table)
    jax.block_until_ready((de, ae, te))

    assert de.shape == (E, NUM_RADIAL)
    assert ae.shape == (T, NUM_SPHERICAL * NUM_RADIAL)
    assert te.shape == (T, NUM_SPHERICAL * NUM_RADIAL * NUM_SPHERICAL)

    de_r, ae_r, te_r = _reference(np.asarray(dist), np.asarray(angle),
                                  np.asarray(torsion), np.asarray(idx_kj))
    for got, want in ((de, de_r), (ae, ae_r), (te, te_r)):
        assert bool(jnp.all(jnp.isfinite(got)))
        assert float(np.max(np.abs(np.asarray(got, np.float64) - want))) < 5e-3

    print("KERNEL_OK")
</pallas_src>

<mosaic_0001>
module attributes {stable_mosaic.version = 11 : i64} {
  func.func @_angle_torsion_kernel(%arg0: i32, %arg1: memref<3x128xf32, #tpu.memory_space<vmem>>, %arg2: memref<18x34xf32, #tpu.memory_space<vmem>>, %arg3: memref<18x128xf32, #tpu.memory_space<vmem>>, %arg4: memref<18x128xf32, #tpu.memory_space<vmem>>, %arg5: memref<18x128xf32, #tpu.memory_space<vmem>>, %arg6: memref<18x128xf32, #tpu.memory_space<vmem>>) attributes {dimension_semantics = [#tpu.dimension_semantics<parallel>], iteration_bounds = array<i64: 1>, scalar_prefetch = 0 : i64, scratch_operands = 0 : i64, tpu.core_type = #tpu.core_type<tc>, window_params = [{transform_indices = @transform_0, window_bounds = array<i64: 3, 128>}, {pipeline_mode = #tpu.pipeline_mode<synchronous>, transform_indices = @transform_1, window_bounds = array<i64: 18, 34>}, {transform_indices = @transform_2, window_bounds = array<i64: 18, 128>}, {transform_indices = @transform_3, window_bounds = array<i64: 18, 128>}, {transform_indices = @transform_4, window_bounds = array<i64: 18, 128>}, {transform_indices = @transform_5, window_bounds = array<i64: 18, 128>}]} {
    %c0 = arith.constant 0 : index
    %c0_0 = arith.constant 0 : index
    %0 = vector.load %arg1[%c0, %c0_0] : memref<3x128xf32, #tpu.memory_space<vmem>>, vector<1x128xf32>
    %cst = arith.constant 2.000000e-01 : f32
    %1 = vector.broadcast %cst : f32 to vector<1x128xf32>
    %2 = arith.mulf %0, %1 : vector<1x128xf32>
    %c1 = arith.constant 1 : index
    %c0_1 = arith.constant 0 : index
    %3 = vector.load %arg1[%c1, %c0_1] : memref<3x128xf32, #tpu.memory_space<vmem>>, vector<1x128xf32>
    %c2 = arith.constant 2 : index
    %c0_2 = arith.constant 0 : index
    %4 = vector.load %arg1[%c2, %c0_2] : memref<3x128xf32, #tpu.memory_space<vmem>>, vector<1x128xf32>
    %c0_3 = arith.constant 0 : index
    %c0_4 = arith.constant 0 : index
    %5 = vector.load %arg2[%c0_3, %c0_4] : memref<18x34xf32, #tpu.memory_space<vmem>>, vector<18x1xf32>
    %6 = vector.broadcast %5 : vector<18x1xf32> to vector<18x128xf32>
    %7 = vector.broadcast %2 : vector<1x128xf32> to vector<18x128xf32>
    %8 = arith.mulf %6, %7 : vector<18x128xf32>
    %9 = tpu.reciprocal %8 {approx = true} : vector<18x128xf32> -> vector<18x128xf32>
    %10 = arith.mulf %8, %9 : vector<18x128xf32>
    %cst_5 = arith.constant 2.000000e+00 : f32
    %11 = vector.broadcast %cst_5 : f32 to vector<18x128xf32>
    %12 = arith.subf %11, %10 : vector<18x128xf32>
    %13 = arith.mulf %9, %12 : vector<18x128xf32>
    %14 = arith.mulf %13, %13 : vector<18x128xf32>
    %15 = arith.mulf %14, %13 : vector<18x128xf32>
    %16 = math.sin %8 : vector<18x128xf32>
    %17 = math.cos %8 : vector<18x128xf32>
    %c0_6 = arith.constant 0 : index
    %c1_7 = arith.constant 1 : index
    %18 = vector.load %arg2[%c0_6, %c1_7] : memref<18x34xf32, #tpu.memory_space<vmem>>, vector<18x1xf32>
    %c0_8 = arith.constant 0 : index
    %c2_9 = arith.constant 2 : index
    %19 = vector.load %arg2[%c0_8, %c2_9] : memref<18x34xf32, #tpu.memory_space<vmem>>, vector<18x1xf32>
    %c0_10 = arith.constant 0 : index
    %c3 = arith.constant 3 : index
    %20 = vector.load %arg2[%c0_10, %c3] : memref<18x34xf32, #tpu.memory_space<vmem>>, vector<18x1xf32>
    %c0_11 = arith.constant 0 : index
    %c4 = arith.constant 4 : index
    %21 = vector.load %arg2[%c0_11, %c4] : memref<18x34xf32, #tpu.memory_space<vmem>>, vector<18x1xf32>
    %c0_12 = arith.constant 0 : index
    %c5 = arith.constant 5 : index
    %22 = vector.load %arg2[%c0_12, %c5] : memref<18x34xf32, #tpu.memory_space<vmem>>, vector<18x1xf32>
    %c0_13 = arith.constant 0 : index
    %c6 = arith.constant 6 : index
    %23 = vector.load %arg2[%c0_13, %c6] : memref<18x34xf32, #tpu.memory_space<vmem>>, vector<18x1xf32>
    %24 = vector.broadcast %18 : vector<18x1xf32> to vector<18x128xf32>
    %25 = arith.mulf %24, %13 : vector<18x128xf32>
    %26 = vector.broadcast %19 : vector<18x1xf32> to vector<18x128xf32>
    %27 = arith.mulf %26, %14 : vector<18x128xf32>
    %28 = arith.addf %25, %27 : vector<18x128xf32>
    %29 = vector.broadcast %20 : vector<18x1xf32> to vector<18x128xf32>
    %30 = arith.mulf %29, %15 : vector<18x128xf32>
    %31 = arith.addf %28, %30 : vector<18x128xf32>
    %32 = arith.mulf %31, %16 : vector<18x128xf32>
    %33 = vector.broadcast %21 : vector<18x1xf32> to vector<18x128xf32>
    %34 = arith.mulf %33, %13 : vector<18x128xf32>
    %35 = vector.broadcast %22 : vector<18x1xf32> to vector<18x128xf32>
    %36 = arith.mulf %35, %14 : vector<18x128xf32>
    %37 = arith.addf %34, %36 : vector<18x128xf32>
    %38 = vector.broadcast %23 : vector<18x1xf32> to vector<18x128xf32>
    %39 = arith.mulf %38, %15 : vector<18x128xf32>
    %40 = arith.addf %37, %39 : vector<18x128xf32>
    %41 = arith.mulf %40, %17 : vector<18x128xf32>
    %42 = arith.addf %32, %41 : vector<18x128xf32>
    %43 = math.cos %3 : vector<1x128xf32>
    %44 = math.sin %3 : vector<1x128xf32>
    %45 = math.cos %4 : vector<1x128xf32>
    %46 = math.sin %4 : vector<1x128xf32>
    %47 = arith.mulf %43, %43 : vector<1x128xf32>
    %48 = arith.mulf %44, %44 : vector<1x128xf32>
    %cst_14 = arith.constant 2.000000e+00 : f32
    %49 = vector.broadcast %cst_14 : f32 to vector<1x128xf32>
    %50 = arith.mulf %49, %45 : vector<1x128xf32>
    %51 = arith.mulf %50, %45 : vector<1x128xf32>
    %cst_15 = arith.constant 1.000000e+00 : f32
    %52 = vector.broadcast %cst_15 : f32 to vector<1x128xf32>
    %53 = arith.subf %51, %52 : vector<1x128xf32>
    %cst_16 = arith.constant 2.000000e+00 : f32
    %54 = vector.broadcast %cst_16 : f32 to vector<1x128xf32>
    %55 = arith.mulf %54, %46 : vector<1x128xf32>
    %56 = arith.mulf %55, %45 : vector<1x128xf32>
    %57 = arith.mulf %44, %45 : vector<1x128xf32>
    %58 = arith.mulf %44, %46 : vector<1x128xf32>
    %59 = arith.mulf %48, %53 : vector<1x128xf32>
    %60 = arith.mulf %48, %56 : vector<1x128xf32>
    %c0_17 = arith.constant 0 : index
    %c7 = arith.constant 7 : index
    %61 = vector.load %arg2[%c0_17, %c7] : memref<18x34xf32, #tpu.memory_space<vmem>>, vector<18x1xf32>
    %c0_18 = arith.constant 0 : index
    %c8 = arith.constant 8 : index
    %62 = vector.load %arg2[%c0_18, %c8] : memref<18x34xf32, #tpu.memory_space<vmem>>, vector<18x1xf32>
    %63 = vector.broadcast %62 : vector<18x1xf32> to vector<18x128xf32>
    %64 = vector.broadcast %43 : vector<1x128xf32> to vector<18x128xf32>
    %65 = arith.mulf %63, %64 : vector<18x128xf32>
    %66 = vector.broadcast %61 : vector<18x1xf32> to vector<18x128xf32>
    %67 = arith.addf %66, %65 : vector<18x128xf32>
    %c0_19 = arith.constant 0 : index
    %c9 = arith.constant 9 : index
    %68 = vector.load %arg2[%c0_19, %c9] : memref<18x34xf32, #tpu.memory_space<vmem>>, vector<18x1xf32>
    %69 = vector.broadcast %68 : vector<18x1xf32> to vector<18x128xf32>
    %70 = vector.broadcast %47 : vector<1x128xf32> to vector<18x128xf32>
    %71 = arith.mulf %69, %70 : vector<18x128xf32>
    %72 = arith.addf %67, %71 : vector<18x128xf32>
    %73 = arith.mulf %42, %72 : vector<18x128xf32>
    %c0_20 = arith.constant 0 : index
    %c0_21 = arith.constant 0 : index
    %74 = vector.load %arg3[%c0_20, %c0_21] : memref<18x128xf32, #tpu.memory_space<vmem>>, vector<18x128xf32>
    tpu.vector_store %arg3[%c0_20, %c0_21], %73 {strides = array<i32>} : memref<18x128xf32, #tpu.memory_space<vmem>>, vector<18x128xf32>,
    %c0_22 = arith.constant 0 : index
    %c10 = arith.constant 10 : index
    %75 = vector.load %arg2[%c0_22, %c10] : memref<18x34xf32, #tpu.memory_space<vmem>>, vector<18x1xf32>
    %c0_23 = arith.constant 0 : index
    %c11 = arith.constant 11 : index
    %76 = vector.load %arg2[%c0_23, %c11] : memref<18x34xf32, #tpu.memory_space<vmem>>, vector<18x1xf32>
    %77 = vector.broadcast %76 : vector<18x1xf32> to vector<18x128xf32>
    %78 = vector.broadcast %43 : vector<1x128xf32> to vector<18x128xf32>
    %79 = arith.mulf %77, %78 : vector<18x128xf32>
    %80 = vector.broadcast %75 : vector<18x1xf32> to vector<18x128xf32>
    %81 = arith.addf %80, %79 : vector<18x128xf32>
    %c0_24 = arith.constant 0 : index
    %c12 = arith.constant 12 : index
    %82 = vector.load %arg2[%c0_24, %c12] : memref<18x34xf32, #tpu.memory_space<vmem>>, vector<18x1xf32>
    %83 = vector.broadcast %82 : vector<18x1xf32> to vector<18x128xf32>
    %84 = vector.broadcast %47 : vector<1x128xf32> to vector<18x128xf32>
    %85 = arith.mulf %83, %84 : vector<18x128xf32>
    %86 = arith.addf %81, %85 : vector<18x128xf32>
    %c0_25 = arith.constant 0 : index
    %c13 = arith.constant 13 : index
    %87 = vector.load %arg2[%c0_25, %c13] : memref<18x34xf32, #tpu.memory_space<vmem>>, vector<18x1xf32>
    %c0_26 = arith.constant 0 : index
    %c14 = arith.constant 14 : index
    %88 = vector.load %arg2[%c0_26, %c14] : memref<18x34xf32, #tpu.memory_space<vmem>>, vector<18x1xf32>
    %89 = vector.broadcast %88 : vector<18x1xf32> to vector<18x128xf32>
    %90 = vector.broadcast %57 : vector<1x128xf32> to vector<18x128xf32>
    %91 = arith.mulf %89, %90 : vector<18x128xf32>
    %92 = vector.broadcast %87 : vector<18x1xf32> to vector<18x128xf32>
    %93 = arith.addf %92, %91 : vector<18x128xf32>
    %c0_27 = arith.constant 0 : index
    %c15 = arith.constant 15 : index
    %94 = vector.load %arg2[%c0_27, %c15] : memref<18x34xf32, #tpu.memory_space<vmem>>, vector<18x1xf32>
    %95 = vector.broadcast %94 : vector<18x1xf32> to vector<18x128xf32>
    %96 = vector.broadcast %58 : vector<1x128xf32> to vector<18x128xf32>
    %97 = arith.mulf %95, %96 : vector<18x128xf32>
    %98 = arith.addf %93, %97 : vector<18x128xf32>
    %c0_28 = arith.constant 0 : index
    %c16 = arith.constant 16 : index
    %99 = vector.load %arg2[%c0_28, %c16] : memref<18x34xf32, #tpu.memory_space<vmem>>, vector<18x1xf32>
    %100 = vector.broadcast %99 : vector<18x1xf32> to vector<18x128xf32>
    %101 = vector.broadcast %59 : vector<1x128xf32> to vector<18x128xf32>
    %102 = arith.mulf %100, %101 : vector<18x128xf32>
    %103 = arith.addf %98, %102 : vector<18x128xf32>
    %c0_29 = arith.constant 0 : index
    %c17 = arith.constant 17 : index
    %104 = vector.load %arg2[%c0_29, %c17] : memref<18x34xf32, #tpu.memory_space<vmem>>, vector<18x1xf32>
    %105 = vector.broadcast %104 : vector<18x1xf32> to vector<18x128xf32>
    %106 = vector.broadcast %60 : vector<1x128xf32> to vector<18x128xf32>
    %107 = arith.mulf %105, %106 : vector<18x128xf32>
    %108 = arith.addf %103, %107 : vector<18x128xf32>
    %109 = arith.mulf %42, %86 : vector<18x128xf32>
    %110 = arith.mulf %109, %108 : vector<18x128xf32>
    %c0_30 = arith.constant 0 : index
    %c0_31 = arith.constant 0 : index
    %111 = vector.load %arg4[%c0_30, %c0_31] : memref<18x128xf32, #tpu.memory_space<vmem>>, vector<18x128xf32>
    tpu.vector_store %arg4[%c0_30, %c0_31], %110 {strides = array<i32>} : memref<18x128xf32, #tpu.memory_space<vmem>>, vector<18x128xf32>,
    %c0_32 = arith.constant 0 : index
    %c18 = arith.constant 18 : index
    %112 = vector.load %arg2[%c0_32, %c18] : memref<18x34xf32, #tpu.memory_space<vmem>>, vector<18x1xf32>
    %c0_33 = arith.constant 0 : index
    %c19 = arith.constant 19 : index
    %113 = vector.load %arg2[%c0_33, %c19] : memref<18x34xf32, #tpu.memory_space<vmem>>, vector<18x1xf32>
    %114 = vector.broadcast %113 : vector<18x1xf32> to vector<18x128xf32>
    %115 = vector.broadcast %43 : vector<1x128xf32> to vector<18x128xf32>
    %116 = arith.mulf %114, %115 : vector<18x128xf32>
    %117 = vector.broadcast %112 : vector<18x1xf32> to vector<18x128xf32>
    %118 = arith.addf %117, %116 : vector<18x128xf32>
    %c0_34 = arith.constant 0 : index
    %c20 = arith.constant 20 : index
    %119 = vector.load %arg2[%c0_34, %c20] : memref<18x34xf32, #tpu.memory_space<vmem>>, vector<18x1xf32>
    %120 = vector.broadcast %119 : vector<18x1xf32> to vector<18x128xf32>
    %121 = vector.broadcast %47 : vector<1x128xf32> to vector<18x128xf32>
    %122 = arith.mulf %120, %121 : vector<18x128xf32>
    %123 = arith.addf %118, %122 : vector<18x128xf32>
    %c0_35 = arith.constant 0 : index
    %c21 = arith.constant 21 : index
    %124 = vector.load %arg2[%c0_35, %c21] : memref<18x34xf32, #tpu.memory_space<vmem>>, vector<18x1xf32>
    %c0_36 = arith.constant 0 : index
    %c22 = arith.constant 22 : index
    %125 = vector.load %arg2[%c0_36, %c22] : memref<18x34xf32, #tpu.memory_space<vmem>>, vector<18x1xf32>
    %126 = vector.broadcast %125 : vector<18x1xf32> to vector<18x128xf32>
    %127 = vector.broadcast %57 : vector<1x128xf32> to vector<18x128xf32>
    %128 = arith.mulf %126, %127 : vector<18x128xf32>
    %129 = vector.broadcast %124 : vector<18x1xf32> to vector<18x128xf32>
    %130 = arith.addf %129, %128 : vector<18x128xf32>
    %c0_37 = arith.constant 0 : index
    %c23 = arith.constant 23 : index
    %131 = vector.load %arg2[%c0_37, %c23] : memref<18x34xf32, #tpu.memory_space<vmem>>, vector<18x1xf32>
    %132 = vector.broadcast %131 : vector<18x1xf32> to vector<18x128xf32>
    %133 = vector.broadcast %58 : vector<1x128xf32> to vector<18x128xf32>
    %134 = arith.mulf %132, %133 : vector<18x128xf32>
    %135 = arith.addf %130, %134 : vector<18x128xf32>
    %c0_38 = arith.constant 0 : index
    %c24 = arith.constant 24 : index
    %136 = vector.load %arg2[%c0_38, %c24] : memref<18x34xf32, #tpu.memory_space<vmem>>, vector<18x1xf32>
    %137 = vector.broadcast %136 : vector<18x1xf32> to vector<18x128xf32>
    %138 = vector.broadcast %59 : vector<1x128xf32> to vector<18x128xf32>
    %139 = arith.mulf %137, %138 : vector<18x128xf32>
    %140 = arith.addf %135, %139 : vector<18x128xf32>
    %c0_39 = arith.constant 0 : index
    %c25 = arith.constant 25 : index
    %141 = vector.load %arg2[%c0_39, %c25] : memref<18x34xf32, #tpu.memory_space<vmem>>, vector<18x1xf32>
    %142 = vector.broadcast %141 : vector<18x1xf32> to vector<18x128xf32>
    %143 = vector.broadcast %60 : vector<1x128xf32> to vector<18x128xf32>
    %144 = arith.mulf %142, %143 : vector<18x128xf32>
    %145 = arith.addf %140, %144 : vector<18x128xf32>
    %146 = arith.mulf %42, %123 : vector<18x128xf32>
    %147 = arith.mulf %146, %145 : vector<18x128xf32>
    %c0_40 = arith.constant 0 : index
    %c0_41 = arith.constant 0 : index
    %148 = vector.load %arg5[%c0_40, %c0_41] : memref<18x128xf32, #tpu.memory_space<vmem>>, vector<18x128xf32>
    tpu.vector_store %arg5[%c0_40, %c0_41], %147 {strides = array<i32>} : memref<18x128xf32, #tpu.memory_space<vmem>>, vector<18x128xf32>,
    %c0_42 = arith.constant 0 : index
    %c26 = arith.constant 26 : index
    %149 = vector.load %arg2[%c0_42, %c26] : memref<18x34xf32, #tpu.memory_space<vmem>>, vector<18x1xf32>
    %c0_43 = arith.constant 0 : index
    %c27 = arith.constant 27 : index
    %150 = vector.load %arg2[%c0_43, %c27] : memref<18x34xf32, #tpu.memory_space<vmem>>, vector<18x1xf32>
    %151 = vector.broadcast %150 : vector<18x1xf32> to vector<18x128xf32>
    %152 = vector.broadcast %43 : vector<1x128xf32> to vector<18x128xf32>
    %153 = arith.mulf %151, %152 : vector<18x128xf32>
    %154 = vector.broadcast %149 : vector<18x1xf32> to vector<18x128xf32>
    %155 = arith.addf %154, %153 : vector<18x128xf32>
    %c0_44 = arith.constant 0 : index
    %c28 = arith.constant 28 : index
    %156 = vector.load %arg2[%c0_44, %c28] : memref<18x34xf32, #tpu.memory_space<vmem>>, vector<18x1xf32>
    %157 = vector.broadcast %156 : vector<18x1xf32> to vector<18x128xf32>
    %158 = vector.broadcast %47 : vector<1x128xf32> to vector<18x128xf32>
    %159 = arith.mulf %157, %158 : vector<18x128xf32>
    %160 = arith.addf %155, %159 : vector<18x128xf32>
    %c0_45 = arith.constant 0 : index
    %c29 = arith.constant 29 : index
    %161 = vector.load %arg2[%c0_45, %c29] : memref<18x34xf32, #tpu.memory_space<vmem>>, vector<18x1xf32>
    %c0_46 = arith.constant 0 : index
    %c30 = arith.constant 30 : index
    %162 = vector.load %arg2[%c0_46, %c30] : memref<18x34xf32, #tpu.memory_space<vmem>>, vector<18x1xf32>
    %163 = vector.broadcast %162 : vector<18x1xf32> to vector<18x128xf32>
    %164 = vector.broadcast %57 : vector<1x128xf32> to vector<18x128xf32>
    %165 = arith.mulf %163, %164 : vector<18x128xf32>
    %166 = vector.broadcast %161 : vector<18x1xf32> to vector<18x128xf32>
    %167 = arith.addf %166, %165 : vector<18x128xf32>
    %c0_47 = arith.constant 0 : index
    %c31 = arith.constant 31 : index
    %168 = vector.load %arg2[%c0_47, %c31] : memref<18x34xf32, #tpu.memory_space<vmem>>, vector<18x1xf32>
    %169 = vector.broadcast %168 : vector<18x1xf32> to vector<18x128xf32>
    %170 = vector.broadcast %58 : vector<1x128xf32> to vector<18x128xf32>
    %171 = arith.mulf %169, %170 : vector<18x128xf32>
    %172 = arith.addf %167, %171 : vector<18x128xf32>
    %c0_48 = arith.constant 0 : index
    %c32 = arith.constant 32 : index
    %173 = vector.load %arg2[%c0_48, %c32] : memref<18x34xf32, #tpu.memory_space<vmem>>, vector<18x1xf32>
    %174 = vector.broadcast %173 : vector<18x1xf32> to vector<18x128xf32>
    %175 = vector.broadcast %59 : vector<1x128xf32> to vector<18x128xf32>
    %176 = arith.mulf %174, %175 : vector<18x128xf32>
    %177 = arith.addf %172, %176 : vector<18x128xf32>
    %c0_49 = arith.constant 0 : index
    %c33 = arith.constant 33 : index
    %178 = vector.load %arg2[%c0_49, %c33] : memref<18x34xf32, #tpu.memory_space<vmem>>, vector<18x1xf32>
    %179 = vector.broadcast %178 : vector<18x1xf32> to vector<18x128xf32>
    %180 = vector.broadcast %60 : vector<1x128xf32> to vector<18x128xf32>
    %181 = arith.mulf %179, %180 : vector<18x128xf32>
    %182 = arith.addf %177, %181 : vector<18x128xf32>
    %183 = arith.mulf %42, %160 : vector<18x128xf32>
    %184 = arith.mulf %183, %182 : vector<18x128xf32>
    %c0_50 = arith.constant 0 : index
    %c0_51 = arith.constant 0 : index
    %185 = vector.load %arg6[%c0_50, %c0_51] : memref<18x128xf32, #tpu.memory_space<vmem>>, vector<18x128xf32>
    tpu.vector_store %arg6[%c0_50, %c0_51], %184 {strides = array<i32>} : memref<18x128xf32, #tpu.memory_space<vmem>>, vector<18x128xf32>,
    return
  }
  func.func @transform_0(%arg0: i32) -> (i32, i32) {
    %c0_i32 = arith.constant 0 : i32
    %c0_i32_0 = arith.constant 0 : i32
    return %c0_i32, %arg0 : i32, i32
  }
  func.func @transform_1(%arg0: i32) -> (i32, i32) {
    %c0_i32 = arith.constant 0 : i32
    %c0_i32_0 = arith.constant 0 : i32
    %c0_i32_1 = arith.constant 0 : i32
    return %c0_i32, %c0_i32_0 : i32, i32
  }
  func.func @transform_2(%arg0: i32) -> (i32, i32) {
    %c0_i32 = arith.constant 0 : i32
    %c0_i32_0 = arith.constant 0 : i32
    return %c0_i32, %arg0 : i32, i32
  }
  func.func @transform_3(%arg0: i32) -> (i32, i32) {
    %c0_i32 = arith.constant 0 : i32
    %c0_i32_0 = arith.constant 0 : i32
    return %c0_i32, %arg0 : i32, i32
  }
  func.func @transform_4(%arg0: i32) -> (i32, i32) {
    %c0_i32 = arith.constant 0 : i32
    %c0_i32_0 = arith.constant 0 : i32
    return %c0_i32, %arg0 : i32, i32
  }
  func.func @transform_5(%arg0: i32) -> (i32, i32) {
    %c0_i32 = arith.constant 0 : i32
    %c0_i32_0 = arith.constant 0 : i32
    return %c0_i32, %arg0 : i32, i32
  }
}

module attributes {stable_mosaic.version = 11 : i64} {
  func.func @_dist_emb_kernel(%arg0: i32, %arg1: memref<1x128xf32, #tpu.memory_space<vmem>>, %arg2: memref<6x128xf32, #tpu.memory_space<vmem>>) attributes {dimension_semantics = [#tpu.dimension_semantics<parallel>], iteration_bounds = array<i64: 1>, scalar_prefetch = 0 : i64, scratch_operands = 0 : i64, tpu.core_type = #tpu.core_type<tc>, window_params = [{transform_indices = @transform_0, window_bounds = array<i64: 1, 128>}, {transform_indices = @transform_1, window_bounds = array<i64: 6, 128>}]} {
    %c0 = arith.constant 0 : index
    %c0_0 = arith.constant 0 : index
    %0 = vector.load %arg1[%c0, %c0_0] : memref<1x128xf32, #tpu.memory_space<vmem>>, vector<1x128xf32>
    %cst = arith.constant 2.000000e-01 : f32
    %1 = vector.broadcast %cst : f32 to vector<1x128xf32>
    %2 = arith.mulf %0, %1 : vector<1x128xf32>
    %3 = arith.mulf %2, %2 : vector<1x128xf32>
    %4 = arith.mulf %3, %3 : vector<1x128xf32>
    %5 = arith.mulf %4, %2 : vector<1x128xf32>
    %6 = arith.mulf %5, %2 : vector<1x128xf32>
    %7 = arith.mulf %6, %2 : vector<1x128xf32>
    %cst_1 = arith.constant 1.000000e+00 : f32
    %8 = vector.broadcast %cst_1 : f32 to vector<1x128xf32>
    %9 = arith.divf %8, %2 : vector<1x128xf32>
    %cst_2 = arith.constant -2.800000e+01 : f32
    %10 = vector.broadcast %cst_2 : f32 to vector<1x128xf32>
    %11 = arith.mulf %10, %5 : vector<1x128xf32>
    %12 = arith.addf %9, %11 : vector<1x128xf32>
    %cst_3 = arith.constant 4.800000e+01 : f32
    %13 = vector.broadcast %cst_3 : f32 to vector<1x128xf32>
    %14 = arith.mulf %13, %6 : vector<1x128xf32>
    %15 = arith.addf %12, %14 : vector<1x128xf32>
    %cst_4 = arith.constant -2.100000e+01 : f32
    %16 = vector.broadcast %cst_4 : f32 to vector<1x128xf32>
    %17 = arith.mulf %16, %7 : vector<1x128xf32>
    %18 = arith.addf %15, %17 : vector<1x128xf32>
    %cst_5 = arith.constant 1.000000e+00 : f32
    %19 = vector.broadcast %cst_5 : f32 to vector<1x128xf32>
    %20 = arith.cmpf olt, %2, %19 : vector<1x128xf32>
    %cst_6 = arith.constant 0.000000e+00 : f32
    %21 = vector.broadcast %cst_6 : f32 to vector<1x128xf32>
    %22 = arith.select %20, %18, %21 : vector<1x128xi1>, vector<1x128xf32>
    %cst_7 = arith.constant 3.14159274 : f32
    %23 = vector.broadcast %cst_7 : f32 to vector<1x128xf32>
    %24 = arith.mulf %23, %2 : vector<1x128xf32>
    %cst_8 = arith.constant 0.000000e+00 : f32
    %25 = vector.broadcast %cst_8 : f32 to vector<1x128xf32>
    %26 = math.sin %24 : vector<1x128xf32>
    %27 = math.cos %24 : vector<1x128xf32>
    %cst_9 = arith.constant 2.000000e+00 : f32
    %28 = vector.broadcast %cst_9 : f32 to vector<1x128xf32>
    %29 = arith.mulf %28, %27 : vector<1x128xf32>
    %30 = arith.mulf %22, %26 : vector<1x128xf32>
    %c0_10 = arith.constant 0 : index
    %c0_11 = arith.constant 0 : index
    %31 = vector.load %arg2[%c0_10, %c0_11] : memref<6x128xf32, #tpu.memory_space<vmem>>, vector<1x128xf32>
    tpu.vector_store %arg2[%c0_10, %c0_11], %30 {strides = array<i32>} : memref<6x128xf32, #tpu.memory_space<vmem>>, vector<1x128xf32>,
    %32 = arith.mulf %29, %26 : vector<1x128xf32>
    %33 = arith.subf %32, %25 : vector<1x128xf32>
    %34 = arith.mulf %22, %33 : vector<1x128xf32>
    %c1 = arith.constant 1 : index
    %c0_12 = arith.constant 0 : index
    %35 = vector.load %arg2[%c1, %c0_12] : memref<6x128xf32, #tpu.memory_space<vmem>>, vector<1x128xf32>
    tpu.vector_store %arg2[%c1, %c0_12], %34 {strides = array<i32>} : memref<6x128xf32, #tpu.memory_space<vmem>>, vector<1x128xf32>,
    %36 = arith.mulf %29, %33 : vector<1x128xf32>
    %37 = arith.subf %36, %26 : vector<1x128xf32>
    %38 = arith.mulf %22, %37 : vector<1x128xf32>
    %c2 = arith.constant 2 : index
    %c0_13 = arith.constant 0 : index
    %39 = vector.load %arg2[%c2, %c0_13] : memref<6x128xf32, #tpu.memory_space<vmem>>, vector<1x128xf32>
    tpu.vector_store %arg2[%c2, %c0_13], %38 {strides = array<i32>} : memref<6x128xf32, #tpu.memory_space<vmem>>, vector<1x128xf32>,
    %40 = arith.mulf %29, %37 : vector<1x128xf32>
    %41 = arith.subf %40, %33 : vector<1x128xf32>
    %42 = arith.mulf %22, %41 : vector<1x128xf32>
    %c3 = arith.constant 3 : index
    %c0_14 = arith.constant 0 : index
    %43 = vector.load %arg2[%c3, %c0_14] : memref<6x128xf32, #tpu.memory_space<vmem>>, vector<1x128xf32>
    tpu.vector_store %arg2[%c3, %c0_14], %42 {strides = array<i32>} : memref<6x128xf32, #tpu.memory_space<vmem>>, vector<1x128xf32>,
    %44 = arith.mulf %29, %41 : vector<1x128xf32>
    %45 = arith.subf %44, %37 : vector<1x128xf32>
    %46 = arith.mulf %22, %45 : vector<1x128xf32>
    %c4 = arith.constant 4 : index
    %c0_15 = arith.constant 0 : index
    %47 = vector.load %arg2[%c4, %c0_15] : memref<6x128xf32, #tpu.memory_space<vmem>>, vector<1x128xf32>
    tpu.vector_store %arg2[%c4, %c0_15], %46 {strides = array<i32>} : memref<6x128xf32, #tpu.memory_space<vmem>>, vector<1x128xf32>,
    %48 = arith.mulf %29, %45 : vector<1x128xf32>
    %49 = arith.subf %48, %41 : vector<1x128xf32>
    %50 = arith.mulf %22, %49 : vector<1x128xf32>
    %c5 = arith.constant 5 : index
    %c0_16 = arith.constant 0 : index
    %51 = vector.load %arg2[%c5, %c0_16] : memref<6x128xf32, #tpu.memory_space<vmem>>, vector<1x128xf32>
    tpu.vector_store %arg2[%c5, %c0_16], %50 {strides = array<i32>} : memref<6x128xf32, #tpu.memory_space<vmem>>, vector<1x128xf32>,
    return
  }
  func.func @transform_0(%arg0: i32) -> (i32, i32) {
    %c0_i32 = arith.constant 0 : i32
    %c0_i32_0 = arith.constant 0 : i32
    return %c0_i32, %arg0 : i32, i32
  }
  func.func @transform_1(%arg0: i32) -> (i32, i32) {
    %c0_i32 = arith.constant 0 : i32
    %c0_i32_0 = arith.constant 0 : i32
    return %c0_i32, %arg0 : i32, i32
  }
}

</mosaic_0001>

<bundles_post_ra>
// kernel: emb_forward.2
= control target key start
LH: loop header
LB: loop body
LE: loop exit
PB: predicated region body
PF: predicated region fallthrough
CT: control target
= control target key end

     0   :  { %s385_s0 = inlined_call_operand.vmem [shape: f32[1,128], index: 0, kind: input, shape index: {}]   ;;  %s386_s1 = inlined_call_operand.hbm [shape: f32[6,128], index: 1, kind: output, shape index: {}]  }
   0x1   :  { %v9_v0 = vld [vmem:[%s385_s0] sm:$0x1] }
   0x2   :  { %v339_v1 = vmul.f32 0.2, %v9_v0 }
   0x3   :  { %6 = vsyncpa [#allocation3], 0  ;;  %v319_v14 = vmov 683565275   ;;  %v320_v16 = vmov 2475754826  }
   0x4   :  { %v342_v2 = vmul.f32 3.1415927, %v339_v1  ;;  %v321_v18 = vmov 2131351028   ;;  %v322_v20 = vmov 2102212464   ;;  %289 = vrcp.f32 %v339_v1 }
   0x5   :  { %v323_v22 = vmov 920167782   ;;  %v324_v29 = vmov 1326507024   ;;  %vm24_vm11 = vcmp.lt.f32.partialorder %v339_v1, 1.0  ;;  %s325_s0 = smov [#allocation2]  }
   0x6   :  { %v30_v3 = vand.u32 2139095040, %v342_v2  ;;  %v27_v5 = vand.u32 2147483647, %v342_v2  ;;  %vm29_vm7 = vcmp.lt.s32.totalorder %v342_v2, 0  ;;  %s262_s8 = sshll.u32 %s325_s0, 4  ;;  %s263_s8 = int_to_ptr.vmem [resolvable:$true] %s262_s8 }
   0x7   :  { %s295_s9 = scalar_lea.vmem %s263_s8, 128  ;;  %p300_p1 = scmp.lt.s32.totalorder %s263_s8, %s263_s8 }
   0x8   :  { %v31_v4 = vshrl.u32 %v30_v3, 23  ;;  %v34_v8 = vand.u32 8388607, %v27_v5  ;;  %vm28_vm8 = vcmp.le.f32.partialorder %v27_v5, 0.7853982  ;;  %p296_p0 = scmp.ne.s32.totalorder %s263_s8, %s295_s9  ;;  %p301_p2 = scmp.lt.s32.totalorder %s295_s9, %s295_s9 }
   0xa   :  { %v270_v6 = vadd.s32 4294967169, %v31_v4  ;;  %v35_v11 = vor.u32 8388608, %v34_v8  ;;  %p302_p3 = por %p301_p2, %p300_p1 }
   0xc   :  { %v37_v7 = vadd.s32 1, %v270_v6  ;;  %v75_v31 = vshll.u32 %v35_v11, 8  ;;  %p303_p4 = pnand %p302_p3, %p296_p0 }
   0xe   :  { %vm38_vm0 = vcmp.gt.s32.totalorder %v37_v7, 0 }
   0xf   :  { %v39_v9 = vsel %vm38_vm0, %v37_v7, 0  ;;  %vm119_vm0 = vweird.f32 %v342_v2 }
  0x10   :  { %v41_v10 = vand.u32 31, %v39_v9  ;;  %v40_v12 = vshrl.u32 %v39_v9, 5  ;;  %v11_v9 = vmul.f32 %v339_v1, %v339_v1 }
  0x12   :  { %v42_v13 = vsub.s32 32, %v41_v10  ;;  %v44_v15 = vshll.u32 %v319_v14, %v41_v10  ;;  %v47_v17 = vshll.u32 %v320_v16, %v41_v10  ;;  %v50_v19 = vshll.u32 %v321_v18, %v41_v10 }
  0x13   :  { %v53_v21 = vshll.u32 %v322_v20, %v41_v10  ;;  %v56_v23 = vshll.u32 %v323_v22, %v41_v10  ;;  %vm59_vm1 = vcmp.lt.s32.totalorder %v40_v12, 1  ;;  %vm60_vm2 = vcmp.lt.s32.totalorder %v40_v12, 2 }
  0x14   :  { %v43_v24 = vshrl.u32 %v319_v14, %v42_v13  ;;  %v45_v25 = vshrl.u32 %v320_v16, %v42_v13  ;;  %v48_v26 = vshrl.u32 %v321_v18, %v42_v13  ;;  %v51_v27 = vshrl.u32 %v322_v20, %v42_v13 }
  0x15   :  { %v54_v28 = vshrl.u32 %v323_v22, %v42_v13  ;;  %v57_v30 = vshrl.u32 %v324_v29, %v42_v13  ;;  %vm61_vm3 = vcmp.lt.s32.totalorder %v40_v12, 3  ;;  %vm62_vm4 = vcmp.lt.s32.totalorder %v40_v12, 4 }
  0x16   :  { %v46_v32 = vor.u32 %v45_v25, %v44_v15  ;;  %v49_v33 = vor.u32 %v48_v26, %v47_v17  ;;  %v52_v34 = vor.u32 %v51_v27, %v50_v19  ;;  %v12_v14 = vmul.f32 %v11_v9, %v11_v9  ;;  %v290_v26 = vpop.eup %289 }
  0x17   :  { %v55_v35 = vor.u32 %v54_v28, %v53_v21  ;;  %v58_v36 = vor.u32 %v57_v30, %v56_v23 }
  0x18   :  { %v63_v37 = vsel %vm59_vm1, %v43_v24, %v46_v32  ;;  %v64_v38 = vsel %vm62_vm4, %v52_v34, 2102212464  ;;  %v67_v39 = vsel %vm59_vm1, %v46_v32, %v49_v33  ;;  %v71_v40 = vsel %vm59_vm1, %v49_v33, %v52_v34 }
  0x19   :  { %v65_v41 = vsel %vm61_vm3, %v49_v33, %v64_v38  ;;  %v68_v42 = vsel %vm62_vm4, %v55_v35, 920167782  ;;  %v72_v43 = vsel %vm62_vm4, %v58_v36, 1326507024  ;;  %v13_v19 = vmul.f32 %v12_v14, %v339_v1 }
  0x1a   :  { %v69_v44 = vsel %vm61_vm3, %v52_v34, %v68_v42  ;;  %v73_v45 = vsel %vm61_vm3, %v55_v35, %v72_v43  ;;  %v66_v46 = vsel %vm60_vm2, %v63_v37, %v65_v41 }
  0x1b   :  { %v70_v47 = vsel %vm60_vm2, %v67_v39, %v69_v44  ;;  %v74_v48 = vsel %vm60_vm2, %v71_v40, %v73_v45  ;;  %v82_v53 = vmul.u32 %v75_v31, %v66_v46  ;;  %v14_v23 = vmul.f32 %v13_v19, %v339_v1 }
  0x1c   :  { %v351_v49 = vmul.u32.u64.low %v75_v31, %v74_v48  ;;  %v352_v50 = vmul.u32.u64.high %v75_v31, %v74_v48, %v351_v49  ;;  %v354_v51 = vmul.u32.u64.low %v75_v31, %v70_v47  ;;  %v355_v52 = vmul.u32.u64.high %v75_v31, %v70_v47, %v354_v51 }
  0x1d   :  { %v18_v24 = vmul.f32 -28.0, %v13_v19  ;;  %v15_v29 = vmul.f32 %v14_v23, %v339_v1  ;;  %v20_v31 = vmul.f32 48.0, %v14_v23 }
  0x1e   :  { %vm84_vm5 = vc.u32 %v352_v50, %v354_v51  ;;  %v85_v54 = vadd.s32 1, %v355_v52  ;;  %v83_v3 = vadd.s32 %v354_v51, %v352_v50 }
  0x1f   :  { %v19_v30 = vadd.f32 %v290_v26, %v18_v24  ;;  %v22_v34 = vmul.f32 -21.0, %v15_v29 }
  0x20   :  { %v86_v55 = vsel %vm84_vm5, %v85_v54, %v355_v52 }
  0x21   :  { %v87_v56 = vadd.s32 %v86_v55, %v82_v53  ;;  %v21_v33 = vadd.f32 %v20_v31, %v19_v30 }
  0x23   :  { %v88_v57 = vadd.s32 536870912, %v87_v56  ;;  %v23_v37 = vadd.f32 %v22_v34, %v21_v33 }
  0x25   :  { %v89_v58 = vshrl.u32 %v88_v57, 30  ;;  %v25_v43 = vsel %vm24_vm11, %v23_v37, 0.0 }
  0x27   :  { %v90_v59 = vshll.u32 %v89_v58, 30  ;;  %v113_v18 = vsub.s32 4, %v89_v58 }
  0x29   :  { %v91_v60 = vsub.s32 %v87_v56, %v90_v59  ;;  %v114_v22 = vsel %vm29_vm7, %v113_v18, %v89_v58 }
  0x2a   :  { %v116_v28 = vsel %vm28_vm8, 0, %v114_v22 }
  0x2b   :  { %v93_v61 = vsub.s32 0, %v91_v60  ;;  %v120_v32 = vadd.s32 3, %v116_v28  ;;  %v224_v35 = vand.u32 3, %v116_v28 }
  0x2d   :  { %v271_v62 = vmin.u32 %v93_v61, %v91_v60  ;;  %v121_v5 = vand.u32 3, %v120_v32  ;;  %vm229_vm10 = vcmp.eq.s32.totalorder %v224_v35, 2  ;;  %vm226_vm13 = vcmp.eq.s32.totalorder %v224_v35, 0 }
  0x2e   :  { %vm225_vm15 = vcmp.lt.s32.totalorder %v224_v35, 2 }
  0x2f   :  { %v95_v63 = vclz %v271_v62  ;;  %vm126_vm9 = vcmp.eq.s32.totalorder %v121_v5, 2  ;;  %vm123_vm12 = vcmp.eq.s32.totalorder %v121_v5, 0  ;;  %vm122_vm14 = vcmp.lt.s32.totalorder %v121_v5, 2 }
  0x31   :  { %v272_v0 = vadd.s32 4294967294, %v95_v63 }
  0x33   :  { %vm273_vm6 = vcmp.lt.s32.totalorder %v272_v0, 0 }
  0x34   :  { %v98_v4 = vsel %vm273_vm6, 0, %v272_v0 }
  0x35   :  { %v99_v6 = vsub.s32 32, %v98_v4  ;;  %v100_v7 = vshll.u32 %v91_v60, %v98_v4  ;;  %v103_v8 = vsub.s32 4294967266, %v98_v4 }
  0x37   :  { %v101_v10 = vshrl.u32 %v83_v3, %v99_v6  ;;  %v104_v11 = vadd.s32 127, %v103_v8 }
  0x39   :  { %v102_v12 = vor.u32 %v101_v10, %v100_v7  ;;  %v105_v13 = vshll.u32 %v104_v11, 23 }
  0x3b   :  { %v106_v15 = vor.u32 4788187, %v105_v13  ;;  %v109_v16 = vcvt.s32.f32 %v102_v12 }
  0x3d   :  { %v107_v17 = vand.u32 2147483647, %v106_v15 }
  0x3f   :  { %v110_v20 = vmul.f32 %v109_v16, %v107_v17 }
  0x41   :  { %v111_v21 = vxor.u32 2147483648, %v110_v20 }
  0x43   :  { %v112_v25 = vsel %vm29_vm7, %v111_v21, %v110_v20 }
  0x44   :  { %v115_v27 = vsel %vm28_vm8, %v342_v2, %v112_v25 }
  0x45   :  { %291 = vcosq.f32 %v115_v27 }
  0x46   :  { %293 = vsinq.f32 %v115_v27 }
  0x4f   :  { %v292_v36 = vpop.eup %291 }
  0x50   :  { %v294_v38 = vpop.eup %293  ;;  %v127_v39 = vxor.u32 2147483648, %v292_v36 }
  0x51   :  { %v124_v40 = vxor.u32 2147483648, %v294_v38 }
  0x52   :  { %v128_v41 = vsel %vm126_vm9, %v127_v39, %v294_v38  ;;  %v231_v42 = vsel %vm229_vm10, %v127_v39, %v294_v38 }
  0x53   :  { %v125_v44 = vsel %vm123_vm12, %v292_v36, %v124_v40  ;;  %v228_v45 = vsel %vm226_vm13, %v292_v36, %v124_v40 }
  0x54   :  { %v129_v46 = vsel %vm122_vm14, %v125_v44, %v128_v41  ;;  %v232_v47 = vsel %vm225_vm15, %v228_v45, %v231_v42 }
  0x55   :  { %v130_v48 = vsel %vm119_vm0, nan, %v129_v46  ;;  %v233_v49 = vsel %vm119_vm0, nan, %v232_v47 }
  0x56   :  { %v234_v50 = vmul.f32 2.0, %v233_v49  ;;  %v235_v51 = vmul.f32 %v130_v48, %v25_v43 }
  0x58   :  { %236 = vst [vmem:[#allocation2] sm:$0x1] %v235_v51  ;;  %v237_v1 = vmul.f32 %v234_v50, %v130_v48 }
  0x5a   :  { %v238_v52 = vmul.f32 %v237_v1, %v25_v43  ;;  %v240_v53 = vmul.f32 %v237_v1, %v234_v50 }
  0x5c   :  { %239 = vst [vmem:[#allocation2 + $0x1] sm:$0x1] %v238_v52  ;;  %v241_v54 = vsub.f32 %v240_v53, %v130_v48 }
  0x5e   :  { %v242_v55 = vmul.f32 %v241_v54, %v25_v43  ;;  %v244_v56 = vmul.f32 %v241_v54, %v234_v50 }
  0x60   :  { %243 = vst [vmem:[#allocation2 + $0x2] sm:$0x1] %v242_v55  ;;  %v245_v2 = vsub.f32 %v244_v56, %v237_v1 }
  0x62   :  { %v246_v57 = vmul.f32 %v245_v2, %v25_v43  ;;  %v248_v58 = vmul.f32 %v245_v2, %v234_v50 }
  0x64   :  { %247 = vst [vmem:[#allocation2 + $0x3] sm:$0x1] %v246_v57  ;;  %v249_v59 = vsub.f32 %v248_v58, %v241_v54 }
  0x66   :  { %v250_v60 = vmul.f32 %v249_v59, %v25_v43  ;;  %v252_v61 = vmul.f32 %v249_v59, %v234_v50 }
  0x68   :  { %251 = vst [vmem:[#allocation2 + $0x4] sm:$0x1] %v250_v60  ;;  %v253_v62 = vsub.f32 %v252_v61, %v245_v2 }
  0x6a   :  { %v254_v63 = vmul.f32 %v253_v62, %v25_v43 }
  0x6c   :  { %255 = vst [vmem:[#allocation2 + $0x5] sm:$0x1] %v254_v63 }
  0x6d   :  { %306 = shalt.err (!%p303_p4)
}
  0x6e   :  { %s307_s12 = scalar_lea.hbm %s386_s1, 128 }
  0x6f   :  { %p308_p5 = scmp.ne.s32.totalorder %s386_s1, %s307_s12  ;;  %p311_p6 = scmp.lt.u32.totalorder %s307_s12, %s386_s1 }
  0x71   :  { %p313_p7 = pnand %p311_p6, %p308_p5 }
  0x73   :  { %316 = shalt.err (!%p313_p7)
}
  0x74   :  { %265 = dma.vmem_to_hbm [thread:$0]  %s263_s8, 128, %s386_s1, [#allocation3]  }
  0x75   :  { %317 = dma.done.wait [#allocation3], 128  }
  0x76   :  { %318 = vsyncadd [#allocation3], 4294967168 }
  0x77   :  { %269 = vsyncpa [#allocation3], 1 }

// kernel: emb_forward.3
= control target key start
LH: loop header
LB: loop body
LE: loop exit
PB: predicated region body
PF: predicated region fallthrough
CT: control target
= control target key end

     0   :  { %v1994_v2 = vmov 0   ;;  %s3133_s0 = inlined_call_operand.vmem [shape: f32[3,128], index: 0, kind: input, shape index: {}]   ;;  %s3134_s1 = inlined_call_operand.vmem [shape: f32[18,34], index: 1, kind: input, shape index: {}]   ;;  %s3135_s2 = inlined_call_operand.hbm [shape: f32[18,128], index: 2, kind: output, shape index: {0}]   ;;  %s3136_s3 = inlined_call_operand.vmem [shape: f32[18,128], index: 3, kind: output, shape index: {1}]   ;;  %s3137_s4 = inlined_call_operand.vmem [shape: f32[18,128], index: 4, kind: output, shape index: {2}]   ;;  %s3138_s5 = inlined_call_operand.vmem [shape: f32[18,128], index: 5, kind: output, shape index: {3}]  }
   0x1   :  { %v2070_v0 = vld [vmem:[%s3134_s1 + $0x10] sm:$0x3]  ;;  %v2075_v1 = vld [vmem:[%s3134_s1] sm:$0xff]  ;;  %1872 = vset.pattern.permute.xlu1 %v1994_v2  ;;  %1871 = vset.pattern.permute.xlu0 %v1994_v2  ;;  %v2082_v3 = vld [vmem:[%s3134_s1 + $0x8] sm:$0xff] }
   0x2   :  { %35 = vperm.xlu1 %1872, %v2070_v0   ;;  %25 = vperm.xlu0 %1871, %v2075_v1  }
   0x3   :  { %11 = vsyncpa [#allocation3], 0  ;;  %v1995_v4 = vmov 1   ;;  %v2091_v5 = vld [vmem:[%s3133_s0 + $0x1] sm:$0x1]  ;;  %v1996_v7 = vmov 2  }
   0x4   :  { %3183 = vst [vmem:[#allocation5_spill] sm:$0xff] %v2091_v5  ;;  %v798_v6 = vand.u32 2139095040, %v2091_v5  ;;  %v1997_v11 = vmov 3   ;;  %v1998_v14 = vmov 4   ;;  %v795_v16 = vand.u32 2147483647, %v2091_v5 }
   0x5   :  { %v3159_v17 = vmov 2102212464   ;;  %v3155_v19 = vmov 920167782   ;;  %v3170_v23 = vmov 683565275  }
   0x6   :  { %1873 = vset.pattern.permute.xlu1 %v1995_v4  ;;  %30 = vperm.xlu0 %1871, %v2082_v3   ;;  %v799_v8 = vshrl.u32 %v798_v6, 23  ;;  %v802_v21 = vand.u32 8388607, %v795_v16  ;;  %v2002_v25 = vmov 2475754826   ;;  %v2004_v32 = vmov 5  }
   0x7   :  { %685 = vperm.xlu1 %1873, %v2075_v1   ;;  %v3161_v28 = vmov 2131351028   ;;  %v3154_v39 = vmov 1326507024   ;;  %v2006_v47 = vmov 6   ;;  %v2007_v61 = vmov 8  }
   0x8   :  { %v1791_v9 = vadd.s32 4294967169, %v799_v8  ;;  %v803_v33 = vor.u32 8388608, %v802_v21  ;;  %v2008_v6 = vmov 7   ;;  %vm797_vm13 = vcmp.lt.s32.totalorder %v2091_v5, 0  ;;  %s2034_s27 = smov [#allocation2]  }
   0x9   :  { %vm2254_vm14 = vcmp.le.f32.partialorder %v795_v16, 0.7853982  ;;  %s1744_s28 = sshll.u32 %s2034_s27, 4  ;;  %s1745_s28 = int_to_ptr.vmem [resolvable:$true] %s1744_s28 }
   0xa   :  { %1874 = vset.pattern.permute.xlu0 %v1995_v4  ;;  %v805_v10 = vadd.s32 1, %v1791_v9  ;;  %v843_v46 = vshll.u32 %v803_v33, 8  ;;  %v2009_v9 = vmov 9   ;;  %s1970_s29 = scalar_lea.vmem %s1745_s28, 384  ;;  %p1975_p1 = scmp.lt.s32.totalorder %s1745_s28, %s1745_s28 }
   0xb   :  { %693 = vperm.xlu1 %1873, %v2070_v0   ;;  %689 = vperm.xlu0 %1874, %v2082_v3   ;;  %p1971_p0 = scmp.ne.s32.totalorder %s1745_s28, %s1970_s29  ;;  %p1976_p2 = scmp.lt.s32.totalorder %s1970_s29, %s1970_s29 }
   0xc   :  { %vm806_vm0 = vcmp.gt.s32.totalorder %v805_v10, 0 }
   0xd   :  { %v807_v12 = vsel %vm806_vm0, %v805_v10, 0  ;;  %p1977_p3 = por %p1976_p2, %p1975_p1 }
   0xe   :  { %v809_v13 = vand.u32 31, %v807_v12  ;;  %v808_v22 = vshrl.u32 %v807_v12, 5 }
   0xf   :  { %1875 = vset.pattern.permute.xlu1 %v1996_v7  ;;  %1876 = vset.pattern.permute.xlu0 %v1996_v7  ;;  %p1978_p4 = pnand %p1977_p3, %p1971_p0 }
  0x10   :  { %700 = vperm.xlu1 %1875, %v2075_v1   ;;  %704 = vperm.xlu0 %1876, %v2082_v3   ;;  %v810_v15 = vsub.s32 32, %v809_v13  ;;  %v821_v18 = vshll.u32 %v3159_v17, %v809_v13  ;;  %v812_v24 = vshll.u32 %v3170_v23, %v809_v13  ;;  %v815_v27 = vshll.u32 %v2002_v25, %v809_v13 }
  0x11   :  { %v818_v30 = vshll.u32 %v3161_v28, %v809_v13  ;;  %v824_v36 = vshll.u32 %v3155_v19, %v809_v13  ;;  %vm827_vm1 = vcmp.lt.s32.totalorder %v808_v22, 1  ;;  %vm828_vm2 = vcmp.lt.s32.totalorder %v808_v22, 2 }
  0x12   :  { %v822_v20 = vshrl.u32 %v3155_v19, %v810_v15  ;;  %v813_v26 = vshrl.u32 %v2002_v25, %v810_v15  ;;  %v816_v29 = vshrl.u32 %v3161_v28, %v810_v15  ;;  %v819_v31 = vshrl.u32 %v3159_v17, %v810_v15 }
  0x13   :  { %v825_v40 = vshrl.u32 %v3154_v39, %v810_v15  ;;  %vm829_vm3 = vcmp.lt.s32.totalorder %v808_v22, 3  ;;  %vm830_vm4 = vcmp.lt.s32.totalorder %v808_v22, 4  ;;  %v811_v48 = vshrl.u32 %v3170_v23, %v810_v15 }
  0x14   :  { %708 = vperm.xlu1 %1875, %v2070_v0   ;;  %1878 = vset.pattern.permute.xlu0 %v1997_v11  ;;  %v814_v34 = vor.u32 %v813_v26, %v812_v24  ;;  %v823_v35 = vor.u32 %v822_v20, %v821_v18  ;;  %v817_v37 = vor.u32 %v816_v29, %v815_v27  ;;  %v2011_v13 = vmov 10   ;;  %v2161_v18 = vld [vmem:[%s3133_s0 + $0x2] sm:$0x1] }
  0x15   :  { %722 = vperm.xlu0 %1878, %v2082_v3   ;;  %v820_v38 = vor.u32 %v819_v31, %v818_v30  ;;  %v826_v41 = vor.u32 %v825_v40, %v824_v36  ;;  %3184 = vst [vmem:[#allocation6_spill] sm:$0xff] %v2161_v18  ;;  %v2012_v20 = vmov 12   ;;  %v1005_v21 = vand.u32 2139095040, %v2161_v18 }
  0x16   :  { %v835_v42 = vsel %vm827_vm1, %v814_v34, %v817_v37  ;;  %v836_v43 = vsel %vm830_vm4, %v823_v35, 920167782  ;;  %v831_v55 = vsel %vm827_vm1, %v811_v48, %v814_v34  ;;  %v2013_v27 = vmov 14  }
  0x17   :  { %v837_v44 = vsel %vm829_vm3, %v820_v38, %v836_v43  ;;  %v839_v45 = vsel %vm827_vm1, %v817_v37, %v820_v38  ;;  %v840_v50 = vsel %vm830_vm4, %v826_v41, 1326507024  ;;  %v832_v51 = vsel %vm830_vm4, %v820_v38, 2102212464 }
  0x18   :  { %1877 = vset.pattern.permute.xlu1 %v1997_v11  ;;  %v838_v49 = vsel %vm828_vm2, %v835_v42, %v837_v44  ;;  %v841_v52 = vsel %vm829_vm3, %v823_v35, %v840_v50  ;;  %v833_v56 = vsel %vm829_vm3, %v817_v37, %v832_v51  ;;  %v2010_v11 = vmov 11  }
  0x19   :  { %718 = vperm.xlu1 %1877, %v2075_v1   ;;  %1880 = vset.pattern.permute.xlu0 %v1998_v14  ;;  %v2123_v53 = vmul.u32.u64.low %v843_v46, %v838_v49  ;;  %v2124_v54 = vmul.u32.u64.high %v843_v46, %v838_v49, %v2123_v53  ;;  %v842_v57 = vsel %vm828_vm2, %v839_v45, %v841_v52  ;;  %v834_v58 = vsel %vm828_vm2, %v831_v55, %v833_v56 }
  0x1a   :  { %743 = vperm.xlu0 %1880, %v2082_v3   ;;  %v2132_v59 = vmul.u32.u64.low %v843_v46, %v842_v57  ;;  %v2133_v60 = vmul.u32.u64.high %v843_v46, %v842_v57, %v2132_v59  ;;  %v850_v62 = vmul.u32 %v843_v46, %v834_v58  ;;  %v1006_v22 = vshrl.u32 %v1005_v21, 23 }
  0x1b   :  { %v853_v63 = vadd.s32 1, %v2124_v54  ;;  %v3146_v35 = vand.u32 2147483647, %v2161_v18  ;;  %v2015_v40 = vmov 15   ;;  %v2016_v58 = vmov 16  }
  0x1c   :  { %vm852_vm5 = vc.u32 %v2133_v60, %v2123_v53  ;;  %v1799_v26 = vadd.s32 4294967169, %v1006_v22  ;;  %v851_v59 = vadd.s32 %v2123_v53, %v2133_v60 }
  0x1d   :  { %726 = vperm.xlu1 %1877, %v2070_v0   ;;  %v854_v2 = vsel %vm852_vm5, %v853_v63, %v2124_v54  ;;  %v1009_v41 = vand.u32 8388607, %v3146_v35 }
  0x1e   :  { %1882 = vset.pattern.permute.xlu0 %v2004_v32  ;;  %v855_v4 = vadd.s32 %v854_v2, %v850_v62  ;;  %v1012_v29 = vadd.s32 1, %v1799_v26 }
  0x1f   :  { %758 = vperm.xlu0 %1882, %v2082_v3   ;;  %v1010_v55 = vor.u32 8388608, %v1009_v41  ;;  %v2018_v41 = vmov 19  }
  0x20   :  { %v856_v7 = vadd.s32 536870912, %v855_v4  ;;  %vm1013_vm6 = vcmp.gt.s32.totalorder %v1012_v29, 0 }
  0x21   :  { %1879 = vset.pattern.permute.xlu1 %v1998_v14  ;;  %v1014_v31 = vsel %vm1013_vm6, %v1012_v29, 0 }
  0x22   :  { %739 = vperm.xlu1 %1879, %v2075_v1   ;;  %v2143_v8 = vshrl.u32 %v856_v7, 30  ;;  %v1016_v33 = vand.u32 31, %v1014_v31  ;;  %v1015_v42 = vshrl.u32 %v1014_v31, 5 }
  0x23   :  { %1884 = vset.pattern.permute.xlu0 %v2006_v47 }
  0x24   :  { %776 = vperm.xlu0 %1884, %v2082_v3   ;;  %v858_v10 = vshll.u32 %v2143_v8, 30  ;;  %v1017_v34 = vsub.s32 32, %v1016_v33  ;;  %v1028_v37 = vshll.u32 %v3159_v17, %v1016_v33  ;;  %v1019_v43 = vshll.u32 %v3170_v23, %v1016_v33 }
  0x25   :  { %v1022_v45 = vshll.u32 %v2002_v25, %v1016_v33  ;;  %v1025_v48 = vshll.u32 %v3161_v28, %v1016_v33  ;;  %v1031_v54 = vshll.u32 %v3155_v19, %v1016_v33  ;;  %vm1034_vm8 = vcmp.lt.s32.totalorder %v1015_v42, 1 }
  0x26   :  { %747 = vperm.xlu1 %1879, %v2070_v0   ;;  %v2151_v12 = vsub.s32 %v855_v4, %v858_v10  ;;  %v1029_v38 = vshrl.u32 %v3155_v19, %v1017_v34  ;;  %v1020_v44 = vshrl.u32 %v2002_v25, %v1017_v34  ;;  %v1023_v46 = vshrl.u32 %v3161_v28, %v1017_v34  ;;  %v2207_v10 = vld [vmem:[%s3134_s1 + $0x10] sm:$0x3] }
  0x27   :  { %v1026_v49 = vshrl.u32 %v3159_v17, %v1017_v34  ;;  %v1032_v57 = vshrl.u32 %v3154_v39, %v1017_v34  ;;  %vm1036_vm9 = vcmp.lt.s32.totalorder %v1015_v42, 3  ;;  %vm1037_vm10 = vcmp.lt.s32.totalorder %v1015_v42, 4 }
  0x28   :  { %1886 = vset.pattern.permute.xlu0 %v2007_v61  ;;  %v861_v14 = vsub.s32 0, %v2151_v12  ;;  %v1030_v50 = vor.u32 %v1029_v38, %v1028_v37  ;;  %v1021_v51 = vor.u32 %v1020_v44, %v1019_v43  ;;  %v1024_v52 = vor.u32 %v1023_v46, %v1022_v45 }
  0x29   :  { %1225 = vperm.xlu0 %1886, %v2082_v3   ;;  %v1027_v56 = vor.u32 %v1026_v49, %v1025_v48  ;;  %v1033_v62 = vor.u32 %v1032_v57, %v1031_v54  ;;  %v1018_v2 = vshrl.u32 %v3170_v23, %v1017_v34  ;;  %vm1035_vm11 = vcmp.lt.s32.totalorder %v1015_v42, 2 }
  0x2a   :  { %1881 = vset.pattern.permute.xlu1 %v2004_v32  ;;  %v1792_v15 = vmin.u32 %v861_v14, %v2151_v12  ;;  %v2014_v32 = vmov 13   ;;  %v1043_v63 = vsel %vm1037_vm10, %v1030_v50, 920167782  ;;  %v1042_v4 = vsel %vm1034_vm8, %v1021_v51, %v1024_v52 }
  0x2b   :  { %754 = vperm.xlu1 %1881, %v2075_v1   ;;  %v1039_v53 = vsel %vm1037_vm10, %v1027_v56, 2102212464  ;;  %v1046_v60 = vsel %vm1034_vm8, %v1024_v52, %v1027_v56  ;;  %v1047_v7 = vsel %vm1037_vm10, %v1033_v62, 1326507024  ;;  %v1038_v14 = vsel %vm1034_vm8, %v1018_v2, %v1021_v51 }
  0x2c   :  { %v863_v24 = vclz %v1792_v15  ;;  %v1040_v15 = vsel %vm1036_vm9, %v1024_v52, %v1039_v53  ;;  %v1048_v22 = vsel %vm1036_vm9, %v1030_v50, %v1047_v7  ;;  %v2020_v51 = vmov 20  }
  0x2d   :  { %1888 = vset.pattern.permute.xlu0 %v2008_v6  ;;  %v1041_v34 = vsel %vm1035_vm11, %v1038_v14, %v1040_v15  ;;  %v881_v2 = vsub.s32 4, %v2143_v8  ;;  %v3148_v53 = vmov 23   ;;  %v3147_v15 = vmov 24  }
  0x2e   :  { %1244 = vperm.xlu0 %1888, %v2082_v3   ;;  %v1793_v30 = vadd.s32 4294967294, %v863_v24  ;;  %v3144_v57 = vmov 27  }
  0x2f   :  { %762 = vperm.xlu1 %1881, %v2070_v0  }
  0x30   :  { %vm1794_vm7 = vcmp.lt.s32.totalorder %v1793_v30, 0 }
  0x31   :  { %v2175_v36 = vsel %vm1794_vm7, 0, %v1793_v30  ;;  %v1049_v30 = vsel %vm1035_vm11, %v1046_v60, %v1048_v22  ;;  %v882_v60 = vsel %vm797_vm13, %v881_v2, %v2143_v8 }
  0x32   :  { %1890 = vset.pattern.permute.xlu0 %v2009_v9  ;;  %v868_v24 = vshll.u32 %v2151_v12, %v2175_v36  ;;  %v2283_v14 = vsel %vm2254_vm14, 0, %v882_v60 }
  0x33   :  { %1883 = vset.pattern.permute.xlu1 %v2006_v47  ;;  %1259 = vperm.xlu0 %1890, %v2082_v3   ;;  %v871_v47 = vsub.s32 4294967266, %v2175_v36  ;;  %3189 = vst [vmem:[#allocation9_spill] sm:$0xff] %v2283_v14 }
  0x34   :  { %772 = vperm.xlu1 %1883, %v2075_v1  }
  0x37   :  { %1892 = vset.pattern.permute.xlu0 %v2010_v11 }
  0x38   :  { %780 = vperm.xlu1 %1883, %v2070_v0   ;;  %1292 = vperm.xlu0 %1892, %v2082_v3  }
  0x3c   :  { %1885 = vset.pattern.permute.xlu1 %v2007_v61  ;;  %1894 = vset.pattern.permute.xlu0 %v2011_v13  ;;  %v872_v61 = vadd.s32 127, %v871_v47  ;;  %v2019_v47 = vmov 18  }
  0x3d   :  { %1221 = vperm.xlu1 %1885, %v2075_v1   ;;  %1308 = vperm.xlu0 %1894, %v2082_v3  }
  0x3e   :  { %v873_v29 = vshll.u32 %v872_v61, 23  ;;  %v38_v61 = vlaneseq }
  0x40   :  { %v874_v12 = vor.u32 4788187, %v873_v29 }
  0x41   :  { %1229 = vperm.xlu1 %1885, %v2070_v0   ;;  %1896 = vset.pattern.permute.xlu0 %v2012_v20 }
  0x42   :  { %1323 = vperm.xlu0 %1896, %v2082_v3   ;;  %v875_v44 = vand.u32 2147483647, %v874_v12 }
  0x45   :  { %1887 = vset.pattern.permute.xlu1 %v2008_v6  ;;  %v1044_v6 = vsel %vm1036_vm9, %v1027_v56, %v1043_v63  ;;  %v3153_v56 = vmov 22   ;;  %v3149_v63 = vmov 21   ;;  %vm887_vm9 = vweird.f32 %v2091_v5 }
  0x46   :  { %1240 = vperm.xlu1 %1887, %v2075_v1   ;;  %1898 = vset.pattern.permute.xlu0 %v2013_v27  ;;  %v1045_v21 = vsel %vm1035_vm11, %v1042_v4, %v1044_v6  ;;  %v39_v4 = vshrl.u32 %v38_v61, 7 }
  0x47   :  { %1341 = vperm.xlu0 %1898, %v2082_v3  }
  0x48   :  { %v2278_v7 = vsub.s32 0, %v39_v4 }
  0x4a   :  { %1248 = vperm.xlu1 %1887, %v2070_v0   ;;  %3188 = vst [vmem:[#allocation8_spill] sm:$0xff] %v2278_v7 }
  0x4b   :  { %1900 = vset.pattern.permute.xlu0 %v2014_v32 }
  0x4c   :  { %1360 = vperm.xlu0 %1900, %v2082_v3  }
  0x4e   :  { %1889 = vset.pattern.permute.xlu1 %v2009_v9  ;;  %v1050_v9 = vshll.u32 %v1010_v55, 8 }
  0x4f   :  { %1255 = vperm.xlu1 %1889, %v2075_v1  }
  0x50   :  { %1902 = vset.pattern.permute.xlu0 %v2015_v40  ;;  %v2219_v31 = vmul.u32.u64.low %v1050_v9, %v1049_v30  ;;  %v2220_v33 = vmul.u32.u64.high %v1050_v9, %v1049_v30, %v2219_v31  ;;  %v2223_v37 = vmul.u32.u64.low %v1050_v9, %v1045_v21  ;;  %v2224_v38 = vmul.u32.u64.high %v1050_v9, %v1045_v21, %v2223_v37 }
  0x51   :  { %1375 = vperm.xlu0 %1902, %v2082_v3   ;;  %v888_v21 = vand.u32 3, %v2283_v14 }
  0x52   :  { %vm1059_vm12 = vc.u32 %v2220_v33, %v2223_v37  ;;  %v1060_v42 = vadd.s32 1, %v2224_v38 }
  0x53   :  { %1263 = vperm.xlu1 %1889, %v2070_v0   ;;  %v867_v0 = vsub.s32 32, %v2175_v36  ;;  %v1057_v36 = vmul.u32 %v1050_v9, %v1041_v34  ;;  %vm890_vm0 = vcmp.eq.s32.totalorder %v888_v21, 0  ;;  %vm893_vm1 = vcmp.eq.s32.totalorder %v888_v21, 2 }
  0x54   :  { %v1061_v46 = vsel %vm1059_vm12, %v1060_v42, %v2224_v38  ;;  %v3145_v38 = vmov 25   ;;  %vm889_vm2 = vcmp.lt.s32.totalorder %v888_v21, 2 }
  0x55   :  { %1904 = vset.pattern.permute.xlu0 %v2016_v58  ;;  %v869_v26 = vshrl.u32 %v851_v59, %v867_v0  ;;  %v1062_v48 = vadd.s32 %v1061_v46, %v1057_v36  ;;  %v1058_v36 = vadd.s32 %v2223_v37, %v2220_v33 }
  0x56   :  { %1397 = vperm.xlu0 %1904, %v2082_v3  }
  0x57   :  { %1891 = vset.pattern.permute.xlu1 %v2010_v11  ;;  %v2017_v11 = vmov 17   ;;  %v870_v43 = vor.u32 %v869_v26, %v868_v24 }
  0x58   :  { %1287 = vperm.xlu1 %1891, %v2075_v1  }
  0x59   :  { %v877_v45 = vcvt.s32.f32 %v870_v43 }
  0x5a   :  { %1906 = vset.pattern.permute.xlu0 %v2017_v11 }
  0x5b   :  { %1419 = vperm.xlu0 %1906, %v2082_v3   ;;  %v878_v49 = vmul.f32 %v877_v45, %v875_v44 }
  0x5c   :  { %1297 = vperm.xlu1 %1891, %v2207_v10  }
  0x5d   :  { %v879_v54 = vxor.u32 2147483648, %v878_v49 }
  0x5f   :  { %1908 = vset.pattern.permute.xlu0 %v2018_v41  ;;  %v880_v59 = vsel %vm797_vm13, %v879_v54, %v878_v49 }
  0x60   :  { %1893 = vset.pattern.permute.xlu1 %v2011_v13  ;;  %1455 = vperm.xlu0 %1908, %v2082_v3   ;;  %v1063_v13 = vadd.s32 536870912, %v1062_v48  ;;  %v883_v62 = vsel %vm2254_vm14, %v2091_v5, %v880_v59 }
  0x61   :  { %1304 = vperm.xlu1 %1893, %v2075_v1   ;;  %1940 = vcosq.f32 %v883_v62 }
  0x62   :  { %v2238_v50 = vshrl.u32 %v1063_v13, 30  ;;  %1942 = vsinq.f32 %v883_v62 }
  0x64   :  { %1910 = vset.pattern.permute.xlu0 %v2019_v47  ;;  %3185 = vst [vmem:[#allocation7_spill] sm:$0xff] %v2238_v50  ;;  %v1065_v52 = vshll.u32 %v2238_v50, 30  ;;  %v3208_v50 = vmov 920167782  }
  0x65   :  { %1312 = vperm.xlu1 %1893, %v2207_v10   ;;  %1471 = vperm.xlu0 %1910, %v2082_v3  }
  0x66   :  { %v2246_v55 = vsub.s32 %v1062_v48, %v1065_v52 }
  0x69   :  { %1895 = vset.pattern.permute.xlu1 %v2012_v20  ;;  %1912 = vset.pattern.permute.xlu0 %v2020_v51  ;;  %v1068_v20 = vsub.s32 0, %v2246_v55 }
  0x6a   :  { %1319 = vperm.xlu1 %1895, %v2075_v1   ;;  %1486 = vperm.xlu0 %1912, %v2082_v3  }
  0x6b   :  { %v1800_v0 = vmin.u32 %v1068_v20, %v2246_v55  ;;  %v2290_v24 = vpop.eup %1940 }
  0x6c   :  { %3190 = vst [vmem:[#allocation10_spill] sm:$0xff] %v2290_v24  ;;  %v3142_v12 = vxor.u32 2147483648, %v2290_v24 }
  0x6d   :  { %v1070_v16 = vclz %v1800_v0 }
  0x6e   :  { %1327 = vperm.xlu1 %1895, %v2207_v10   ;;  %1914 = vset.pattern.permute.xlu0 %v3153_v56 }
  0x6f   :  { %1504 = vperm.xlu0 %1914, %v2082_v3   ;;  %v1801_v6 = vadd.s32 4294967294, %v1070_v16 }
  0x71   :  { %vm1802_vm15 = vcmp.lt.s32.totalorder %v1801_v6, 0 }
  0x72   :  { %1897 = vset.pattern.permute.xlu1 %v2013_v27  ;;  %v16_v27 = vld [vmem:[%s3133_s0] sm:$0x1]  ;;  %v1073_v22 = vsel %vm1802_vm15, 0, %v1801_v6 }
  0x73   :  { %1337 = vperm.xlu1 %1897, %v2075_v1   ;;  %1916 = vset.pattern.permute.xlu0 %v3149_v63  ;;  %v17_v9 = vmul.f32 0.2, %v16_v27  ;;  %v1078_v30 = vsub.s32 4294967266, %v1073_v22  ;;  %v1074_v42 = vsub.s32 32, %v1073_v22  ;;  %v1075_v62 = vshll.u32 %v2246_v55, %v1073_v22 }
  0x74   :  { %1519 = vperm.xlu0 %1916, %v2082_v3   ;;  %v3140_v55 = vmov 26  }
  0x75   :  { %v41_v8 = vrot.slane %v17_v9, %v2278_v7  ;;  %v1079_v49 = vadd.s32 127, %v1078_v30  ;;  %v1076_v16 = vshrl.u32 %v1058_v36, %v1074_v42 }
  0x77   :  { %1345 = vperm.xlu1 %1897, %v2207_v10   ;;  %v1080_v4 = vshll.u32 %v1079_v49, 23 }
  0x78   :  { %1918 = vset.pattern.permute.xlu0 %v3148_v53 }
  0x79   :  { %1534 = vperm.xlu0 %1918, %v2082_v3   ;;  %v2346_v21 = vor.u32 4788187, %v1080_v4 }
  0x7b   :  { %1899 = vset.pattern.permute.xlu1 %v2014_v32  ;;  %v2292_v32 = vpop.eup %1942 }
  0x7c   :  { %1356 = vperm.xlu1 %1899, %v2075_v1   ;;  %3191 = vst [vmem:[#allocation11_spill] sm:$0xff] %v2292_v32  ;;  %v3143_v43 = vxor.u32 2147483648, %v2292_v32  ;;  %v895_v59 = vsel %vm893_vm1, %v3142_v12, %v2292_v32 }
  0x7d   :  { %1920 = vset.pattern.permute.xlu0 %v3147_v15 }
  0x7e   :  { %1552 = vperm.xlu0 %1920, %v2082_v3  }
  0x80   :  { %1364 = vperm.xlu1 %1899, %v2207_v10  }
  0x81   :  { %v36_v26 = vpop.permute.xlu1 %35  ;;  %v26_v29 = vpop.permute.xlu0 %25 }
  0x82   :  { %v2295_v31 = vmul.f32 %v41_v8, %v36_v26  ;;  %v2297_v34 = vmul.f32 %v41_v8, %v26_v29  ;;  %1922 = vset.pattern.permute.xlu0 %v3145_v38 }
  0x83   :  { %1570 = vperm.xlu0 %1922, %v2082_v3  }
  0x84   :  { %v271_v44 = vand.u32 2147483647, %v2295_v31  ;;  %v274_v45 = vand.u32 2139095040, %v2295_v31  ;;  %v3150_v46 = vand.u32 2147483647, %v2297_v34  ;;  %v66_v48 = vand.u32 2139095040, %v2297_v34  ;;  %1901 = vset.pattern.permute.xlu1 %v2015_v40 }
  0x85   :  { %1371 = vperm.xlu1 %1901, %v2075_v1   ;;  %v31_v13 = vpop.permute.xlu0 %30  ;;  %v892_v40 = vsel %vm890_vm0, %v2290_v24, %v3143_v43  ;;  %1944 = vrcp.f32 %v2297_v34  ;;  %vm273_vm1 = vcmp.lt.s32.totalorder %v2295_v31, 0 }
  0x86   :  { %v275_v52 = vshrl.u32 %v274_v45, 23  ;;  %v278_v54 = vand.u32 8388607, %v271_v44  ;;  %v67_v33 = vshrl.u32 %v66_v48, 23  ;;  %v70_v37 = vand.u32 8388607, %v3150_v46  ;;  %v2315_v20 = vpop.permute.xlu1 %685 }
  0x87   :  { %1924 = vset.pattern.permute.xlu0 %v3144_v57  ;;  %v2329_v2 = vmul.f32 %v41_v8, %v31_v13  ;;  %v2337_v45 = vsel %vm889_vm2, %v892_v40, %v895_v59  ;;  %v2341_v8 = vor.u32 %v1076_v16, %v1075_v62  ;;  %1946 = vrcp.f32 %v2295_v31  ;;  %v2372_v16 = vld [vmem:[%s3134_s1 + $0x10] sm:$0x3] }
  0x88   :  { %v1775_v0 = vadd.s32 4294967169, %v275_v52  ;;  %v1767_v61 = vadd.s32 4294967169, %v67_v33  ;;  %1602 = vperm.xlu0 %1924, %v2082_v3   ;;  %v279_v27 = vor.u32 8388608, %v278_v54  ;;  %v71_v60 = vor.u32 8388608, %v70_v37  ;;  %3193 = vst [vmem:[#allocation13_spill] sm:$0xff] %v2372_v16 }
  0x89   :  { %1379 = vperm.xlu1 %1901, %v2207_v10   ;;  %3192 = vst [vmem:[#allocation12_spill] sm:$0xff] %v2329_v2  ;;  %v170_v30 = vand.u32 2139095040, %v2329_v2  ;;  %1948 = vrcp.f32 %v2329_v2  ;;  %vm2563_vm2 = vcmp.le.f32.partialorder %v271_v44, 0.7853982 }
  0x8a   :  { %v281_v6 = vadd.s32 1, %v1775_v0  ;;  %v73_v9 = vadd.s32 1, %v1767_v61  ;;  %v2331_v26 = vpop.permute.xlu1 %693  ;;  %v2333_v29 = vpop.permute.xlu0 %689  ;;  %v2350_v13 = vshll.u32 %v279_v27, 8  ;;  %v2352_v49 = vshll.u32 %v71_v60, 8 }
  0x8b   :  { %v2362_v37 = vshrl.u32 %v170_v30, 23 }
  0x8c   :  { %vm282_vm3 = vcmp.gt.s32.totalorder %v281_v6, 0  ;;  %vm74_vm4 = vcmp.gt.s32.totalorder %v73_v9, 0  ;;  %1926 = vset.pattern.permute.xlu0 %v3140_v55 }
  0x8d   :  { %v283_v22 = vsel %vm282_vm3, %v281_v6, 0  ;;  %v75_v36 = vsel %vm74_vm4, %v73_v9, 0  ;;  %1903 = vset.pattern.permute.xlu1 %v2016_v58  ;;  %1618 = vperm.xlu0 %1926, %v2082_v3   ;;  %v3158_v58 = vand.u32 2147483647, %v2329_v2  ;;  %v3139_v6 = vmov 30  }
  0x8e   :  { %v2348_v42 = vshrl.u32 %v283_v22, 5  ;;  %v285_v48 = vand.u32 31, %v283_v22  ;;  %1393 = vperm.xlu1 %1903, %v2075_v1   ;;  %v2355_v52 = vshrl.u32 %v75_v36, 5  ;;  %v2357_v54 = vand.u32 31, %v75_v36 }
  0x8f   :  { %v2359_v33 = vpop.permute.xlu1 %700  ;;  %v2364_v40 = vpop.permute.xlu0 %704 }
  0x90   :  { %v286_v59 = vsub.s32 32, %v285_v48  ;;  %v288_v0 = vshll.u32 %v3170_v23, %v285_v48  ;;  %v291_v61 = vshll.u32 %v2002_v25, %v285_v48  ;;  %v294_v62 = vshll.u32 %v3161_v28, %v285_v48  ;;  %v2398_v63 = vpop.eup %1944 }
  0x91   :  { %v297_v4 = vshll.u32 %v3159_v17, %v285_v48  ;;  %v300_v27 = vshll.u32 %v3155_v19, %v285_v48  ;;  %vm303_vm5 = vcmp.lt.s32.totalorder %v2348_v42, 1  ;;  %vm304_vm6 = vcmp.lt.s32.totalorder %v2348_v42, 2  ;;  %1928 = vset.pattern.permute.xlu0 %v3139_v6 }
  0x92   :  { %v287_v60 = vshrl.u32 %v3170_v23, %v286_v59  ;;  %v289_v9 = vshrl.u32 %v2002_v25, %v286_v59  ;;  %v292_v30 = vshrl.u32 %v3161_v28, %v286_v59  ;;  %v295_v22 = vshrl.u32 %v3159_v17, %v286_v59  ;;  %1401 = vperm.xlu1 %1903, %v2207_v10  }
  0x93   :  { %v298_v36 = vshrl.u32 %v3155_v19, %v286_v59  ;;  %v301_v48 = vshrl.u32 %v3154_v39, %v286_v59  ;;  %vm305_vm7 = vcmp.lt.s32.totalorder %v2348_v42, 3  ;;  %vm306_vm8 = vcmp.lt.s32.totalorder %v2348_v42, 4  ;;  %1655 = vperm.xlu0 %1928, %v2372_v16   ;;  %v2389_v6 = vpop.permute.xlu1 %708 }
  0x94   :  { %v290_v55 = vor.u32 %v289_v9, %v288_v0  ;;  %v293_v12 = vor.u32 %v292_v30, %v291_v61  ;;  %v296_v43 = vor.u32 %v295_v22, %v294_v62  ;;  %v78_v57 = vsub.s32 32, %v2357_v54  ;;  %v2392_v38 = vpop.permute.xlu0 %722 }
  0x95   :  { %v299_v35 = vor.u32 %v298_v36, %v297_v4  ;;  %v302_v15 = vor.u32 %v301_v48, %v300_v27  ;;  %v80_v59 = vshll.u32 %v3170_v23, %v2357_v54  ;;  %v83_v53 = vshll.u32 %v2002_v25, %v2357_v54  ;;  %v2409_v4 = vpop.eup %1946 }
  0x96   :  { %v307_v46 = vsel %vm303_vm5, %v287_v60, %v290_v55  ;;  %v308_v0 = vsel %vm306_vm8, %v296_v43, 2102212464  ;;  %v311_v61 = vsel %vm303_vm5, %v290_v55, %v293_v12  ;;  %v315_v62 = vsel %vm303_vm5, %v293_v12, %v296_v43  ;;  %1905 = vset.pattern.permute.xlu1 %v2017_v11 }
  0x97   :  { %v309_v27 = vsel %vm305_vm7, %v293_v12, %v308_v0  ;;  %v312_v9 = vsel %vm306_vm8, %v299_v35, 920167782  ;;  %v316_v60 = vsel %vm306_vm8, %v302_v15, 1326507024  ;;  %v79_v30 = vshrl.u32 %v3170_v23, %v78_v57  ;;  %1415 = vperm.xlu1 %1905, %v2075_v1  }
  0x98   :  { %v3151_v22 = vmov 29   ;;  %v310_v11 = vsel %vm304_vm6, %v307_v46, %v309_v27  ;;  %v313_v55 = vsel %vm305_vm7, %v296_v43, %v312_v9  ;;  %v317_v12 = vsel %vm305_vm7, %v299_v35, %v316_v60  ;;  %v2428_v15 = vpop.permute.xlu1 %718 }
  0x99   :  { %1930 = vset.pattern.permute.xlu0 %v3151_v22  ;;  %v81_v36 = vshrl.u32 %v2002_v25, %v78_v57  ;;  %v314_v48 = vsel %vm304_vm6, %v311_v61, %v313_v55  ;;  %v318_v0 = vsel %vm304_vm6, %v315_v62, %v317_v12  ;;  %v326_v46 = vmul.u32 %v2350_v13, %v310_v11  ;;  %v2436_v43 = vpop.permute.xlu0 %743 }
  0x9a   :  { %1670 = vperm.xlu0 %1930, %v2372_v16   ;;  %v84_v27 = vshrl.u32 %v3161_v28, %v78_v57  ;;  %v2439_v35 = vmul.u32.u64.low %v2350_v13, %v318_v0  ;;  %v2440_v9 = vmul.u32.u64.high %v2350_v13, %v318_v0, %v2439_v35  ;;  %v86_v62 = vshll.u32 %v3161_v28, %v2357_v54 }
  0x9b   :  { %v2443_v60 = vmul.u32.u64.low %v2350_v13, %v314_v48  ;;  %v2444_v22 = vmul.u32.u64.high %v2350_v13, %v314_v48, %v2443_v60  ;;  %v82_v61 = vor.u32 %v81_v36, %v80_v59  ;;  %v87_v11 = vshrl.u32 %v3159_v17, %v78_v57  ;;  %1423 = vperm.xlu1 %1905, %v2207_v10  }
  0x9c   :  { %v85_v42 = vor.u32 %v84_v27, %v83_v53  ;;  %v89_v55 = vshll.u32 %v3159_v17, %v2357_v54  ;;  %v90_v12 = vshrl.u32 %v3155_v19, %v78_v57  ;;  %v92_v13 = vshll.u32 %v3155_v19, %v2357_v54  ;;  %v2459_v53 = vpop.permute.xlu1 %726 }
  0x9d   :  { %v93_v48 = vshrl.u32 %v3154_v39, %v78_v57  ;;  %v3152_v0 = vmov 31   ;;  %v88_v59 = vor.u32 %v87_v11, %v86_v62  ;;  %vm95_vm10 = vcmp.lt.s32.totalorder %v2355_v52, 1 }
  0x9e   :  { %1932 = vset.pattern.permute.xlu0 %v3152_v0  ;;  %vm96_vm11 = vcmp.lt.s32.totalorder %v2355_v52, 2  ;;  %vm97_vm12 = vcmp.lt.s32.totalorder %v2355_v52, 3  ;;  %vm328_vm13 = vc.u32 %v2440_v9, %v2443_v60  ;;  %v329_v10 = vadd.s32 1, %v2444_v22  ;;  %v2468_v36 = vpop.permute.xlu0 %758 }
  0x9f   :  { %1685 = vperm.xlu0 %1932, %v2372_v16   ;;  %v91_v57 = vor.u32 %v90_v12, %v89_v55  ;;  %v94_v54 = vor.u32 %v93_v48, %v92_v13  ;;  %vm98_vm14 = vcmp.lt.s32.totalorder %v2355_v52, 4  ;;  %v99_v27 = vsel %vm95_vm10, %v79_v30, %v82_v61  ;;  %1907 = vset.pattern.permute.xlu1 %v2018_v41 }
  0xa0   :  { %v103_v35 = vsel %vm95_vm10, %v82_v61, %v85_v42  ;;  %v107_v62 = vsel %vm95_vm10, %v85_v42, %v88_v59  ;;  %v330_v11 = vsel %vm328_vm13, %v329_v10, %v2444_v22  ;;  %v100_v0 = vsel %vm98_vm14, %v88_v59, 2102212464  ;;  %1450 = vperm.xlu1 %1907, %v2075_v1   ;;  %v2486_v22 = vld [vmem:[%s3134_s1 + $0x10] sm:$0x3] }
  0xa1   :  { %v104_v56 = vsel %vm98_vm14, %v91_v57, 920167782  ;;  %v108_v39 = vsel %vm98_vm14, %v94_v54, 1326507024  ;;  %v331_v19 = vadd.s32 %v330_v11, %v326_v46  ;;  %v101_v55 = vsel %vm97_vm12, %v85_v42, %v100_v0  ;;  %v2481_v41 = vpop.permute.xlu1 %739 }
  0xa2   :  { %v105_v12 = vsel %vm97_vm12, %v88_v59, %v104_v56  ;;  %v109_v30 = vsel %vm97_vm12, %v91_v57, %v108_v39  ;;  %v3157_v61 = vmov 28   ;;  %v48_v56 = vmul.f32 %v2398_v63, %v2297_v34 }
  0xa3   :  { %1935 = vset.pattern.permute.xlu0 %v3157_v61  ;;  %v106_v46 = vsel %vm96_vm11, %v103_v35, %v105_v12  ;;  %v110_v42 = vsel %vm96_vm11, %v107_v62, %v109_v30  ;;  %v1771_v39 = vadd.s32 4294967169, %v2362_v37  ;;  %v332_v13 = vadd.s32 536870912, %v331_v19  ;;  %v2501_v59 = vpop.permute.xlu0 %776 }
  0xa4   :  { %1633 = vperm.xlu0 %1935, %v2082_v3   ;;  %v2497_v48 = vmul.u32.u64.low %v2352_v49, %v110_v42  ;;  %v2498_v0 = vmul.u32.u64.high %v2352_v49, %v110_v42, %v2497_v48  ;;  %v102_v10 = vsel %vm96_vm11, %v99_v27, %v101_v55  ;;  %v51_v3 = vsub.f32 2.0, %v48_v56  ;;  %1460 = vperm.xlu1 %1907, %v2486_v22  }
  0xa5   :  { %v2506_v57 = vmul.u32.u64.low %v2352_v49, %v106_v46  ;;  %v2507_v54 = vmul.u32.u64.high %v2352_v49, %v106_v46, %v2506_v57  ;;  %v333_v37 = vshrl.u32 %v332_v13, 30  ;;  %v2511_v35 = vpop.permute.xlu1 %747  ;;  %v897_v62 = vsel %vm887_vm9, nan, %v2337_v45 }
  0xa6   :  { %v50_v11 = vmul.f32 %v2409_v4, %v2295_v31  ;;  %v177_v52 = vadd.s32 1, %v1771_v39  ;;  %v1082_v27 = vand.u32 2147483647, %v2346_v21  ;;  %v1084_v55 = vcvt.s32.f32 %v2341_v8 }
  0xa7   :  { %v334_v12 = vshll.u32 %v333_v37, 30  ;;  %v118_v30 = vmul.u32 %v2352_v49, %v102_v10  ;;  %vm120_vm15 = vc.u32 %v2498_v0, %v2506_v57  ;;  %v2524_v46 = vmul.f32 %v2398_v63, %v51_v3 }
  0xa8   :  { %v121_v42 = vadd.s32 1, %v2507_v54  ;;  %v174_v45 = vand.u32 8388607, %v3158_v58  ;;  %1909 = vset.pattern.permute.xlu1 %v2019_v47  ;;  %v2530_v56 = vpop.permute.xlu0 %1225  ;;  %v1209_v21 = vmul.f32 %v897_v62, %v897_v62  ;;  %v53_v39 = vsub.f32 2.0, %v50_v11 }
  0xa9   :  { %3194 = vst [vmem:[#allocation14_spill] sm:$0xff] %v2530_v56  ;;  %v2532_v8 = vsub.s32 %v331_v19, %v334_v12  ;;  %1467 = vperm.xlu1 %1909, %v2075_v1   ;;  %vm178_vm0 = vcmp.gt.s32.totalorder %v177_v52, 0  ;;  %v2538_v13 = vmul.f32 %v1084_v55, %v1082_v27  ;;  %v2543_v47 = vmul.f32 %v2524_v46, %v2524_v46 }
  0xaa   :  { %v122_v49 = vsel %vm120_vm15, %v121_v42, %v2507_v54  ;;  %v2536_v63 = vpop.permute.xlu1 %754  ;;  %v357_v3 = vsub.s32 4, %v333_v37  ;;  %v175_v19 = vor.u32 8388608, %v174_v45  ;;  %v2546_v12 = vrot.slane %v897_v62, %v2278_v7  ;;  %v2551_v54 = vpop.eup %1948 }
  0xab   :  { %3195 = vst [vmem:[#allocation15_spill] sm:$0xff] %v2536_v63  ;;  %3196 = vst [vmem:[#allocation16_spill] sm:$0xff] %v2538_v13  ;;  %v337_v48 = vsub.s32 0, %v2532_v8  ;;  %v123_v10 = vadd.s32 %v122_v49, %v118_v30  ;;  %v2549_v1 = vrot.slane %v1209_v21, %v2278_v7  ;;  %v179_v55 = vsel %vm178_vm0, %v177_v52, 0 }
  0xac   :  { %3197 = vst [vmem:[#allocation17_spill] sm:$0xff] %v2543_v47  ;;  %3198 = vst [vmem:[#allocation18_spill] sm:$0xff] %v2546_v12  ;;  %v2559_v42 = vmul.f32 %v2409_v4, %v53_v39  ;;  %v711_v61 = vmul.f32 %v2359_v33, %v2543_v47  ;;  %v181_v4 = vand.u32 31, %v179_v55  ;;  %v327_v39 = vadd.s32 %v2443_v60, %v2440_v9 }
  0xad   :  { %3199 = vst [vmem:[#allocation19_spill] sm:$0xff] %v2549_v1  ;;  %v1776_v11 = vmin.u32 %v337_v48, %v2532_v8  ;;  %v124_v27 = vadd.s32 536870912, %v123_v10  ;;  %1475 = vperm.xlu1 %1909, %v2486_v22   ;;  %v2556_v30 = vpop.permute.xlu0 %1244  ;;  %v358_v44 = vsel %vm273_vm1, %v357_v3, %v333_v37  ;;  %v2579_v58 = vshll.u32 %v175_v19, 8 }
  0xae   :  { %3200 = vst [vmem:[#allocation20_spill] sm:$0xff] %v2556_v30  ;;  %v2567_v45 = vpop.permute.xlu1 %762  ;;  %v2583_v21 = vmul.f32 %v2551_v54, %v2329_v2  ;;  %v182_v33 = vsub.s32 32, %v181_v4  ;;  %v2591_v9 = vmul.f32 %v2331_v26, %v2559_v42  ;;  %v2595_v60 = vmul.f32 %v2559_v42, %v2559_v42 }
  0xaf   :  { %v339_v52 = vclz %v1776_v11  ;;  %v2571_v48 = vshrl.u32 %v124_v27, 30  ;;  %v696_v27 = vmul.f32 %v2315_v20, %v2524_v46  ;;  %v2599_v37 = vmul.f32 %v2543_v47, %v2524_v46 }
  0xb0   :  { %v2603_v3 = vadd.s32 %v2506_v57, %v2498_v0  ;;  %v184_v17 = vshll.u32 %v3170_v23, %v181_v4  ;;  %v187_v28 = vshll.u32 %v2002_v25, %v181_v4  ;;  %v3205_v7 = vmov 2131351028  }
  0xb1   :  { %v126_v11 = vshll.u32 %v2571_v48, 30  ;;  %v1777_v49 = vadd.s32 4294967294, %v339_v52  ;;  %1911 = vset.pattern.permute.xlu1 %v2020_v51  ;;  %v2608_v51 = vld [vmem:[%s3134_s1] sm:$0xff]  ;;  %v2615_v19 = vadd.f32 %v711_v61, %v696_v27  ;;  %v2619_v52 = vsel %vm2563_vm2, 0, %v358_v44 }
  0xb2   :  { %1482 = vperm.xlu1 %1911, %v2608_v51   ;;  %v2611_v20 = vpop.permute.xlu0 %1259  ;;  %v190_v5 = vshll.u32 %v3205_v7, %v181_v4  ;;  %v185_v61 = vshrl.u32 %v2002_v25, %v182_v33  ;;  %v180_v30 = vshrl.u32 %v179_v55, 5  ;;  %v3206_v44 = vmov 2102212464  }
  0xb3   :  { %3203 = vst [vmem:[#allocation21_spill] sm:$0xff] %v2611_v20  ;;  %v2613_v26 = vsub.s32 %v123_v10, %v126_v11  ;;  %vm1778_vm3 = vcmp.lt.s32.totalorder %v1777_v49, 0  ;;  %v2621_v0 = vpop.permute.xlu1 %772  ;;  %v188_v11 = vshrl.u32 %v3205_v7, %v182_v33  ;;  %v191_v24 = vshrl.u32 %v3206_v44, %v182_v33 }
  0xb4   :  { %3204 = vst [vmem:[#allocation22_spill] sm:$0xff] %v2621_v0  ;;  %v342_v57 = vsel %vm1778_vm3, 0, %v1777_v49  ;;  %v193_v32 = vshll.u32 %v3206_v44, %v181_v4  ;;  %v3207_v16 = vmov 683565275   ;;  %v194_v2 = vshrl.u32 %v3208_v50, %v182_v33 }
  0xb5   :  { %v129_v20 = vsub.s32 0, %v2613_v26  ;;  %v343_v10 = vsub.s32 32, %v342_v57  ;;  %v347_v27 = vsub.s32 4294967266, %v342_v57  ;;  %v183_v56 = vshrl.u32 %v3207_v16, %v182_v33 }
  0xb6   :  { %1490 = vperm.xlu1 %1911, %v2486_v22   ;;  %v344_v7 = vshll.u32 %v2532_v8, %v342_v57  ;;  %v196_v14 = vshll.u32 %v3208_v50, %v181_v4  ;;  %v3210_v1 = vmov 1326507024   ;;  %v186_v12 = vor.u32 %v185_v61, %v184_v17 }
  0xb7   :  { %v1768_v49 = vmin.u32 %v129_v20, %v2613_v26  ;;  %v345_v23 = vshrl.u32 %v327_v39, %v343_v10  ;;  %v2635_v13 = vpop.permute.xlu1 %780  ;;  %v2637_v25 = vpop.permute.xlu0 %1292  ;;  %v348_v55 = vadd.s32 127, %v347_v27  ;;  %v197_v44 = vshrl.u32 %v3210_v1, %v182_v33 }
  0xb8   :  { %3209 = vst [vmem:[#allocation23_spill] sm:$0xff] %v2635_v13  ;;  %v189_v0 = vor.u32 %v188_v11, %v187_v28  ;;  %v192_v20 = vor.u32 %v191_v24, %v190_v5  ;;  %v195_v16 = vor.u32 %v194_v2, %v193_v32  ;;  %v3211_v47 = vmov 22  }
  0xb9   :  { %v131_v18 = vclz %v1768_v49  ;;  %v346_v39 = vor.u32 %v345_v23, %v344_v7  ;;  %v349_v10 = vshll.u32 %v348_v55, 23  ;;  %v198_v63 = vor.u32 %v197_v44, %v196_v14 }
  0xba   :  { %1913 = vset.pattern.permute.xlu1 %v3211_v47  ;;  %vm199_vm4 = vcmp.lt.s32.totalorder %v180_v30, 1  ;;  %vm200_vm5 = vcmp.lt.s32.totalorder %v180_v30, 2  ;;  %vm201_vm6 = vcmp.lt.s32.totalorder %v180_v30, 3  ;;  %vm202_vm7 = vcmp.lt.s32.totalorder %v180_v30, 4 }
  0xbb   :  { %v1769_v13 = vadd.s32 4294967294, %v131_v18  ;;  %1500 = vperm.xlu1 %1913, %v2608_v51   ;;  %v350_v8 = vor.u32 4788187, %v349_v10  ;;  %v353_v50 = vcvt.s32.f32 %v346_v39  ;;  %v203_v1 = vsel %vm199_vm4, %v183_v56, %v186_v12 }
  0xbc   :  { %v2645_v17 = vpop.permute.xlu1 %1221  ;;  %v2647_v5 = vpop.permute.xlu0 %1308  ;;  %vm65_vm8 = vcmp.lt.s32.totalorder %v2297_v34, 0  ;;  %v204_v23 = vsel %vm202_vm7, %v192_v20, 2102212464  ;;  %v207_v28 = vsel %vm199_vm4, %v186_v12, %v189_v0  ;;  %v208_v18 = vsel %vm202_vm7, %v195_v16, 920167782 }
  0xbd   :  { %vm1770_vm10 = vcmp.lt.s32.totalorder %v1769_v13, 0  ;;  %v351_v24 = vand.u32 2147483647, %v350_v8  ;;  %v205_v32 = vsel %vm201_vm6, %v189_v0, %v204_v23  ;;  %v209_v2 = vsel %vm201_vm6, %v192_v20, %v208_v18 }
  0xbe   :  { %v134_v14 = vsel %vm1770_vm10, 0, %v1769_v13  ;;  %v149_v33 = vsub.s32 4, %v2571_v48  ;;  %v3212_v57 = vand.u32 2147483647, %v2297_v34  ;;  %v210_v61 = vsel %vm200_vm5, %v207_v28, %v209_v2 }
  0xbf   :  { %v135_v56 = vsub.s32 32, %v134_v14  ;;  %v136_v47 = vshll.u32 %v2613_v26, %v134_v14  ;;  %v139_v4 = vsub.s32 4294967266, %v134_v14  ;;  %1508 = vperm.xlu1 %1913, %v2486_v22   ;;  %v354_v13 = vmul.f32 %v353_v50, %v351_v24 }
  0xc0   :  { %vm2660_vm11 = vcmp.le.f32.partialorder %v3212_v57, 0.7853982  ;;  %v211_v11 = vsel %vm199_vm4, %v189_v0, %v192_v20  ;;  %v212_v27 = vsel %vm202_vm7, %v198_v63, 1326507024  ;;  %v2667_v49 = vpop.permute.xlu1 %1229  ;;  %v206_v55 = vsel %vm200_vm5, %v203_v1, %v205_v32 }
  0xc1   :  { %v137_v26 = vshrl.u32 %v2603_v3, %v135_v56  ;;  %v140_v7 = vadd.s32 127, %v139_v4  ;;  %v213_v44 = vsel %vm201_vm6, %v195_v16, %v212_v27  ;;  %v2672_v39 = vpop.permute.xlu0 %1323  ;;  %v355_v10 = vxor.u32 2147483648, %v354_v13 }
  0xc2   :  { %v214_v8 = vsel %vm200_vm5, %v211_v11, %v213_v44  ;;  %v2676_v50 = vmul.u32.u64.low %v2579_v58, %v210_v61  ;;  %v2677_v23 = vmul.u32.u64.high %v2579_v58, %v210_v61, %v2676_v50  ;;  %v3215_v28 = vmov 21  }
  0xc3   :  { %v138_v63 = vor.u32 %v137_v26, %v136_v47  ;;  %v141_v0 = vshll.u32 %v140_v7, 23  ;;  %v2681_v20 = vmul.u32.u64.low %v2579_v58, %v214_v8  ;;  %v2682_v3 = vmul.u32.u64.high %v2579_v58, %v214_v8, %v2681_v20  ;;  %1915 = vset.pattern.permute.xlu1 %v3215_v28 }
  0xc4   :  { %v713_v16 = vmul.f32 %v2389_v6, %v2595_v60  ;;  %v356_v30 = vsel %vm273_vm1, %v355_v10, %v354_v13  ;;  %v364_v1 = vadd.s32 3, %v2619_v52  ;;  %v52_v18 = vsub.f32 2.0, %v2583_v21  ;;  %1515 = vperm.xlu1 %1915, %v2608_v51  }
  0xc5   :  { %v142_v14 = vor.u32 4788187, %v141_v0  ;;  %v145_v24 = vcvt.s32.f32 %v138_v63  ;;  %v359_v32 = vsel %vm2563_vm2, %v2295_v31, %v356_v30  ;;  %v222_v2 = vmul.u32 %v2579_v58, %v206_v55  ;;  %v2696_v56 = vpop.permute.xlu1 %1240 }
  0xc6   :  { %v150_v6 = vsel %vm65_vm8, %v149_v33, %v2571_v48  ;;  %1950 = vcosq.f32 %v359_v32  ;;  %v225_v47 = vadd.s32 1, %v2677_v23  ;;  %v55_v21 = vmul.f32 %v2551_v54, %v52_v18  ;;  %v2703_v4 = vpop.permute.xlu0 %1341 }
  0xc7   :  { %v143_v57 = vand.u32 2147483647, %v142_v14  ;;  %v729_v62 = vmul.f32 %v2428_v15, %v2599_v37  ;;  %1952 = vsinq.f32 %v359_v32  ;;  %vm224_vm12 = vc.u32 %v2682_v3, %v2676_v50 }
  0xc8   :  { %v2709_v58 = vand.u32 3, %v364_v1  ;;  %v226_v13 = vsel %vm224_vm12, %v225_v47, %v2677_v23  ;;  %v697_v48 = vmul.f32 %v2333_v29, %v55_v21  ;;  %v58_v33 = vmul.f32 %v55_v21, %v55_v21  ;;  %1523 = vperm.xlu1 %1915, %v2486_v22   ;;  %v3218_v47 = vld [vmem:[#allocation15_spill] sm:$0xff] }
  0xc9   :  { %v146_v54 = vmul.f32 %v145_v24, %v143_v57  ;;  %v152_v61 = vsel %vm2660_vm11, 0, %v150_v6  ;;  %v62_v15 = vmul.f32 %v2595_v60, %v2559_v42  ;;  %v227_v11 = vadd.s32 %v226_v13, %v222_v2  ;;  %v2718_v27 = vpop.permute.xlu1 %1248  ;;  %v3217_v6 = vld [vmem:[#allocation17_spill] sm:$0xff]  ;;  %v3219_v13 = vld [vmem:[#allocation23_spill] sm:$0xff] }
  0xca   :  { %v716_v26 = vadd.f32 %v713_v16, %v2591_v9  ;;  %v2723_v7 = vmul.f32 %v2481_v41, %v2524_v46  ;;  %v712_v29 = vmul.f32 %v2364_v40, %v58_v33  ;;  %v61_v55 = vmul.f32 %v58_v33, %v55_v21 }
  0xcb   :  { %v147_v44 = vxor.u32 2147483648, %v146_v54  ;;  %v2727_v10 = vadd.f32 %v729_v62, %v2615_v19  ;;  %v731_v8 = vmul.f32 %v2459_v53, %v62_v15  ;;  %v228_v23 = vadd.s32 536870912, %v227_v11  ;;  %v2730_v63 = vpop.permute.xlu0 %1360 }
  0xcc   :  { %v156_v0 = vadd.s32 3, %v152_v61  ;;  %vm366_vm13 = vcmp.lt.s32.totalorder %v2709_v58, 2  ;;  %vm367_vm14 = vcmp.eq.s32.totalorder %v2709_v58, 0  ;;  %v715_v9 = vadd.f32 %v712_v29, %v697_v48 }
  0xcd   :  { %v730_v41 = vmul.f32 %v2392_v38, %v61_v55  ;;  %v3216_v46 = vmov 23   ;;  %v148_v40 = vsel %vm65_vm8, %v147_v44, %v146_v54  ;;  %vm363_vm15 = vweird.f32 %v2295_v31 }
  0xce   :  { %1917 = vset.pattern.permute.xlu1 %v3216_v46  ;;  %vm370_vm0 = vcmp.eq.s32.totalorder %v2709_v58, 2  ;;  %v2740_v53 = vshrl.u32 %v228_v23, 30  ;;  %v751_v19 = vmul.f32 %v2436_v43, %v55_v21  ;;  %v151_v20 = vsel %vm2660_vm11, %v2297_v34, %v148_v40  ;;  %v2752_v30 = vpop.permute.xlu1 %1255 }
  0xcf   :  { %1530 = vperm.xlu1 %1917, %v2608_v51   ;;  %v767_v38 = vmul.f32 %v2567_v45, %v2595_v60  ;;  %v2749_v28 = vadd.f32 %v730_v41, %v715_v9  ;;  %v674_v16 = vand.u32 3, %v2619_v52  ;;  %1954 = vcosq.f32 %v151_v20  ;;  %v3221_v9 = vld [vmem:[#allocation22_spill] sm:$0xff] }
  0xd0   :  { %v734_v1 = vadd.f32 %v731_v8, %v716_v26  ;;  %v230_v18 = vshll.u32 %v2740_v53, 30  ;;  %v766_v43 = vmul.f32 %v2468_v36, %v58_v33  ;;  %v1951_v14 = vpop.eup %1950  ;;  %1956 = vsinq.f32 %v151_v20  ;;  %v2761_v60 = vpop.permute.xlu0 %1375 }
  0xd1   :  { %v2756_v24 = vand.u32 3, %v156_v0  ;;  %v752_v12 = vmul.f32 %v2511_v35, %v2559_v42  ;;  %v784_v45 = vmul.f32 %v2501_v59, %v61_v55  ;;  %v1953_v52 = vpop.eup %1952  ;;  %v371_v32 = vxor.u32 2147483648, %v1951_v14 }
  0xd2   :  { %v2763_v2 = vsub.s32 %v227_v11, %v230_v18  ;;  %v765_v21 = vmul.f32 %v3218_v47, %v3217_v6  ;;  %v769_v57 = vadd.f32 %v766_v43, %v751_v19  ;;  %v368_v36 = vxor.u32 2147483648, %v1953_v52  ;;  %v1264_v35 = vpop.permute.xlu1 %1263  ;;  %v2798_v19 = vld [vmem:[%s3133_s0 + $0x2] sm:$0x1]  ;;  %v3227_v47 = vld [vmem:[#allocation19_spill] sm:$0xff] }
  0xd3   :  { %1538 = vperm.xlu1 %1917, %v2486_v22   ;;  %v770_v62 = vadd.f32 %v767_v38, %v752_v12  ;;  %vm679_vm1 = vcmp.eq.s32.totalorder %v674_v16, 2  ;;  %v785_v48 = vmul.f32 %v3219_v13, %v62_v15  ;;  %v372_v59 = vsel %vm370_vm0, %v371_v32, %v1953_v52  ;;  %v3222_v43 = vld [vmem:[#allocation18_spill] sm:$0xff] }
  0xd4   :  { %v233_v42 = vsub.s32 0, %v2763_v2  ;;  %vm676_vm2 = vcmp.eq.s32.totalorder %v674_v16, 0  ;;  %v681_v33 = vsel %vm679_vm1, %v371_v32, %v1953_v52  ;;  %vm155_vm3 = vweird.f32 %v2297_v34  ;;  %v3223_v12 = vld [vmem:[#allocation6_spill] sm:$0xff] }
  0xd5   :  { %v369_v54 = vsel %vm367_vm14, %v1951_v14, %v368_v36  ;;  %vm675_vm4 = vcmp.lt.s32.totalorder %v674_v16, 2  ;;  %v678_v11 = vsel %vm676_vm2, %v1951_v14, %v368_v36  ;;  %v2775_v26 = vadd.f32 %v784_v45, %v769_v57  ;;  %v2781_v23 = vpop.permute.xlu0 %1397 }
  0xd6   :  { %v373_v15 = vsel %vm366_vm13, %v369_v54, %v372_v59  ;;  %v1772_v29 = vmin.u32 %v233_v42, %v2763_v2  ;;  %v468_v55 = vand.u32 3, %v152_v61  ;;  %v682_v44 = vsel %vm675_vm4, %v678_v11, %v681_v33 }
  0xd7   :  { %v3220_v8 = vmov 24   ;;  %v374_v0 = vsel %vm363_vm15, nan, %v373_v15  ;;  %v783_v41 = vmul.f32 %v3221_v9, %v2599_v37  ;;  %v683_v46 = vsel %vm363_vm15, nan, %v682_v44  ;;  %v2793_v61 = vpop.permute.xlu1 %1287 }
  0xd8   :  { %1919 = vset.pattern.permute.xlu1 %v3220_v8  ;;  %v788_v40 = vadd.f32 %v785_v48, %v770_v62  ;;  %vm158_vm5 = vcmp.lt.s32.totalorder %v2756_v24, 2  ;;  %vm159_vm6 = vcmp.eq.s32.totalorder %v2756_v24, 0  ;;  %vm162_vm7 = vcmp.eq.s32.totalorder %v2756_v24, 2 }
  0xd9   :  { %1548 = vperm.xlu1 %1919, %v2608_v51   ;;  %v235_v58 = vclz %v1772_v29  ;;  %vm1004_vm8 = vcmp.lt.s32.totalorder %v2798_v19, 0  ;;  %v737_v31 = vmul.f32 %v734_v1, %v374_v0  ;;  %v768_v37 = vadd.f32 %v765_v21, %v2723_v7  ;;  %v1955_v16 = vpop.eup %1954 }
  0xda   :  { %v223_v20 = vadd.s32 %v2676_v50, %v2682_v3  ;;  %v791_v38 = vmul.f32 %v788_v40, %v683_v46  ;;  %vm469_vm10 = vcmp.lt.s32.totalorder %v468_v55, 2  ;;  %vm473_vm11 = vcmp.eq.s32.totalorder %v468_v55, 2  ;;  %v1957_v1 = vpop.eup %1956  ;;  %v2815_v3 = vpop.permute.xlu0 %1419 }
  0xdb   :  { %v1773_v18 = vadd.s32 4294967294, %v235_v58  ;;  %v1238_v14 = vmul.f32 %v3222_v43, %v2667_v49  ;;  %v3224_v45 = vand.u32 2147483647, %v3223_v12  ;;  %v163_v32 = vxor.u32 2147483648, %v1955_v16  ;;  %v2819_v57 = vpop.permute.xlu1 %1297  ;;  %v3232_v12 = vld [vmem:[#allocation12_spill] sm:$0xff] }
  0xdc   :  { %vm470_vm13 = vcmp.eq.s32.totalorder %v468_v55, 0  ;;  %v786_v7 = vadd.f32 %v783_v41, %v768_v37  ;;  %v1236_v50 = vmul.f32 %v3222_v43, %v2645_v17  ;;  %v160_v6 = vxor.u32 2147483648, %v1957_v1 }
  0xdd   :  { %vm2808_vm12 = vcmp.le.f32.partialorder %v3224_v45, 0.7853982  ;;  %1556 = vperm.xlu1 %1919, %v2486_v22   ;;  %vm1774_vm14 = vcmp.lt.s32.totalorder %v1773_v18, 0  ;;  %v1253_v49 = vadd.f32 %v2718_v27, %v1238_v14  ;;  %v1272_v21 = vmul.f32 %v3227_v47, %v1264_v35  ;;  %v3233_v45 = vld [vmem:[#allocation7_spill] sm:$0xff] }
  0xde   :  { %v164_v36 = vsel %vm162_vm7, %v163_v32, %v1957_v1  ;;  %v238_v62 = vsel %vm1774_vm14, 0, %v1773_v18  ;;  %v475_v13 = vsel %vm473_vm11, %v163_v32, %v1957_v1  ;;  %v2824_v48 = vadd.f32 %v791_v38, %v737_v31 }
  0xdf   :  { %v161_v17 = vsel %vm159_vm6, %v1955_v16, %v160_v6  ;;  %v239_v59 = vsub.s32 32, %v238_v62  ;;  %v240_v42 = vshll.u32 %v2763_v2, %v238_v62  ;;  %v243_v33 = vsub.s32 4294967266, %v238_v62  ;;  %v2839_v2 = vpop.permute.xlu0 %1455 }
  0xe0   :  { %v165_v27 = vsel %vm158_vm5, %v161_v17, %v164_v36  ;;  %v472_v35 = vsel %vm470_vm13, %v1955_v16, %v160_v6  ;;  %v1270_v54 = vmul.f32 %v3227_v47, %v2752_v30  ;;  %v1275_v11 = vadd.f32 %v1272_v21, %v1253_v49  ;;  %v2846_v46 = vpop.permute.xlu1 %1304  ;;  %v2878_v21 = vld [vmem:[%s3134_s1] sm:$0xff] }
  0xe1   :  { %v3228_v15 = vmov 25   ;;  %v166_v29 = vsel %vm155_vm3, nan, %v165_v27  ;;  %v241_v44 = vshrl.u32 %v223_v20, %v239_v59  ;;  %v244_v8 = vadd.s32 127, %v243_v33  ;;  %v3230_v20 = vld [vmem:[#allocation16_spill] sm:$0xff] }
  0xe2   :  { %1921 = vset.pattern.permute.xlu1 %v3228_v15  ;;  %v476_v0 = vsel %vm469_vm10, %v472_v35, %v475_v13  ;;  %v735_v24 = vmul.f32 %v2727_v10, %v166_v29  ;;  %v253_v9 = vsub.s32 4, %v2740_v53  ;;  %v1278_v41 = vmul.f32 %v1275_v11, %v2824_v48  ;;  %v3239_v11 = vld [vmem:[#allocation14_spill] sm:$0xff] }
  0xe3   :  { %1566 = vperm.xlu1 %1921, %v2608_v51   ;;  %v477_v30 = vsel %vm155_vm3, nan, %v476_v0  ;;  %v242_v40 = vor.u32 %v241_v44, %v240_v42  ;;  %v245_v58 = vshll.u32 %v244_v8, 23  ;;  %v1251_v55 = vadd.f32 %v2696_v56, %v1236_v50  ;;  %v3229_v51 = vld [vmem:[#allocation9_spill] sm:$0xff]  ;;  %v2906_v0 = vld [vmem:[%s3134_s1 + $0x8] sm:$0xff] }
  0xe4   :  { %v789_v31 = vmul.f32 %v786_v7, %v477_v30  ;;  %1281 = vst [vmem:[#allocation2 + $0x10] sm:$0x3] %v1278_v41  ;;  %v991_v37 = vadd.s32 3, %v3229_v51  ;;  %v3231_v10 = vxor.u32 2147483648, %v3230_v20  ;;  %vm169_vm15 = vcmp.lt.s32.totalorder %v3232_v12, 0  ;;  %v2867_v7 = vpop.permute.xlu1 %1312  ;;  %v2869_v50 = vpop.permute.xlu0 %1471  ;;  %v3240_v41 = vld [vmem:[#allocation13_spill] sm:$0xff] }
  0xe5   :  { %v246_v34 = vor.u32 4788187, %v245_v58  ;;  %v249_v16 = vcvt.s32.f32 %v242_v40  ;;  %v1273_v14 = vadd.f32 %v1270_v54, %v1251_v55  ;;  %v3234_v56 = vsub.s32 4, %v3233_v45  ;;  %v3241_v58 = vld [vmem:[#allocation11_spill] sm:$0xff]  ;;  %v3243_v55 = vld [vmem:[#allocation10_spill] sm:$0xff] }
  0xe6   :  { %v1087_v38 = vsel %vm1004_vm8, %v3231_v10, %v3230_v20  ;;  %v2855_v18 = vadd.f32 %v789_v31, %v735_v24  ;;  %v992_v36 = vand.u32 3, %v991_v37  ;;  %v3235_v62 = vand.u32 2147483647, %v3232_v12 }
  0xe7   :  { %1574 = vperm.xlu1 %1921, %v2486_v22   ;;  %v1089_v1 = vsel %vm1004_vm8, %v3234_v56, %v3233_v45  ;;  %v1090_v32 = vsel %vm2808_vm12, %v2798_v19, %v1087_v38  ;;  %v247_v6 = vand.u32 2147483647, %v246_v34  ;;  %v254_v22 = vsel %vm169_vm15, %v253_v9, %v2740_v53  ;;  %v3246_v56 = vld [vmem:[#allocation21_spill] sm:$0xff] }
  0xe8   :  { %v1276_v49 = vmul.f32 %v1273_v14, %v2855_v18  ;;  %1958 = vcosq.f32 %v1090_v32  ;;  %vm2882_vm0 = vcmp.le.f32.partialorder %v3235_v62, 0.7853982  ;;  %v1091_v53 = vsel %vm2808_vm12, 0, %v1089_v1  ;;  %v3245_v14 = vld [vmem:[#allocation20_spill] sm:$0xff] }
  0xe9   :  { %v250_v17 = vmul.f32 %v249_v16, %v247_v6  ;;  %1960 = vsinq.f32 %v1090_v32  ;;  %v3238_v59 = vmov 27   ;;  %v256_v42 = vsel %vm2882_vm0, 0, %v254_v22  ;;  %v2892_v35 = vpop.permute.xlu1 %1319  ;;  %v2894_v54 = vpop.permute.xlu0 %1486 }
  0xea   :  { %1279 = vst [vmem:[#allocation2] sm:$0xff] %v1276_v49  ;;  %v1198_v33 = vadd.s32 3, %v1091_v53  ;;  %v1237_v15 = vmul.f32 %v3222_v43, %v3239_v11  ;;  %vm994_vm1 = vcmp.eq.s32.totalorder %v992_v36, 0  ;;  %v2032_v52 = vmov 32  }
  0xeb   :  { %1923 = vset.pattern.permute.xlu1 %v3238_v59  ;;  %v251_v27 = vxor.u32 2147483648, %v250_v17  ;;  %1937 = vset.pattern.permute.xlu0 %v2032_v52  ;;  %v260_v44 = vadd.s32 3, %v256_v42  ;;  %v2901_v8 = vand.u32 3, %v256_v42  ;;  %vm997_vm2 = vcmp.eq.s32.totalorder %v992_v36, 2 }
  0xec   :  { %1597 = vperm.xlu1 %1923, %v2878_v21   ;;  %1699 = vperm.xlu0 %1937, %v2906_v0   ;;  %v1095_v9 = vand.u32 3, %v1091_v53  ;;  %v1199_v30 = vand.u32 3, %v1198_v33  ;;  %vm993_vm3 = vcmp.lt.s32.totalorder %v992_v36, 2  ;;  %v3242_v31 = vxor.u32 2147483648, %v3241_v58 }
  0xed   :  { %v252_v29 = vsel %vm169_vm15, %v251_v27, %v250_v17  ;;  %v2913_v40 = vpop.permute.xlu1 %1327  ;;  %v3244_v37 = vxor.u32 2147483648, %v3243_v55  ;;  %v2924_v38 = vand.u32 3, %v260_v44  ;;  %v2033_v34 = vmov 33  }
  0xee   :  { %v255_v24 = vsel %vm2882_vm0, %v3232_v12, %v252_v29  ;;  %v996_v51 = vsel %vm994_vm1, %v3243_v55, %v3242_v31  ;;  %v2922_v10 = vpop.permute.xlu0 %1504  ;;  %vm573_vm4 = vcmp.eq.s32.totalorder %v2901_v8, 0  ;;  %v1252_v45 = vadd.f32 %v3245_v14, %v1237_v15 }
  0xef   :  { %1962 = vcosq.f32 %v255_v24  ;;  %v999_v20 = vsel %vm997_vm2, %v3244_v37, %v3241_v58  ;;  %v1271_v1 = vmul.f32 %v3227_v47, %v3246_v56  ;;  %vm1100_vm5 = vcmp.eq.s32.totalorder %v1095_v9, 2 }
  0xf0   :  { %1607 = vperm.xlu1 %1923, %v3240_v41   ;;  %1964 = vsinq.f32 %v255_v24  ;;  %1939 = vset.pattern.permute.xlu0 %v2033_v34  ;;  %vm1204_vm6 = vcmp.eq.s32.totalorder %v1199_v30, 2  ;;  %v3247_v32 = vmov 26   ;;  %vm572_vm7 = vcmp.lt.s32.totalorder %v2901_v8, 2 }
  0xf1   :  { %1717 = vperm.xlu0 %1939, %v2906_v0   ;;  %v1000_v22 = vsel %vm993_vm3, %v996_v51, %v999_v20  ;;  %vm1097_vm8 = vcmp.eq.s32.totalorder %v1095_v9, 0  ;;  %vm1201_vm10 = vcmp.eq.s32.totalorder %v1199_v30, 0  ;;  %vm259_vm11 = vweird.f32 %v3232_v12 }
  0xf2   :  { %v1959_v16 = vpop.eup %1958  ;;  %v1301_v62 = vmul.f32 %v2637_v25, %v3222_v43  ;;  %vm1096_vm12 = vcmp.lt.s32.totalorder %v1095_v9, 2  ;;  %vm1200_vm13 = vcmp.lt.s32.totalorder %v1199_v30, 2  ;;  %v2939_v17 = vpop.permute.xlu1 %1337  ;;  %vm262_vm14 = vcmp.lt.s32.totalorder %v2924_v38, 2 }
  0xf3   :  { %v1961_v6 = vpop.eup %1960  ;;  %v1101_v49 = vxor.u32 2147483648, %v1959_v16  ;;  %vm1094_vm15 = vweird.f32 %v2798_v19  ;;  %v2945_v59 = vpop.permute.xlu0 %1519  ;;  %vm263_vm0 = vcmp.eq.s32.totalorder %v2924_v38, 0  ;;  %v1001_v25 = vsel %vm887_vm9, nan, %v1000_v22 }
  0xf4   :  { %1925 = vset.pattern.permute.xlu1 %v3247_v32  ;;  %v1098_v13 = vxor.u32 2147483648, %v1961_v6  ;;  %vm266_vm1 = vcmp.eq.s32.totalorder %v2924_v38, 2  ;;  %vm576_vm2 = vcmp.eq.s32.totalorder %v2901_v8, 2  ;;  %v3249_v29 = vmov 30  }
  0xf5   :  { %1614 = vperm.xlu1 %1925, %v2878_v21   ;;  %v1102_v36 = vsel %vm1100_vm5, %v1101_v49, %v1961_v6  ;;  %v1206_v53 = vsel %vm1204_vm6, %v1101_v49, %v1961_v6  ;;  %v1274_v44 = vadd.f32 %v1271_v1, %v1252_v45  ;;  %v1316_v24 = vadd.f32 %v2647_v5, %v1301_v62  ;;  %v3250_v1 = vld [vmem:[#allocation8_spill] sm:$0xff] }
  0xf6   :  { %v1099_v33 = vsel %vm1097_vm8, %v1959_v16, %v1098_v13  ;;  %v1203_v27 = vsel %vm1201_vm10, %v1959_v16, %v1098_v13  ;;  %v2961_v30 = vpop.permute.xlu1 %1345  ;;  %v1331_v5 = vmul.f32 %v2672_v39, %v3227_v47  ;;  %v1210_v14 = vmul.f32 %v1001_v25, %v1001_v25 }
  0xf7   :  { %v1103_v11 = vsel %vm1096_vm12, %v1099_v33, %v1102_v36  ;;  %v1207_v15 = vsel %vm1200_vm13, %v1203_v27, %v1206_v53  ;;  %v1464_v45 = vmul.f32 %v2839_v2, %v3222_v43  ;;  %v1494_v36 = vmul.f32 %v2894_v54, %v3227_v47 }
  0xf8   :  { %v1104_v41 = vsel %vm1094_vm15, nan, %v1103_v11  ;;  %v1208_v9 = vsel %vm1094_vm15, nan, %v1207_v15  ;;  %v1535_v19 = vpop.permute.xlu0 %1534 }
  0xf9   :  { %1927 = vset.pattern.permute.xlu1 %v3249_v29  ;;  %v1963_v58 = vpop.eup %1962  ;;  %v1216_v31 = vmul.f32 %v1104_v41, %v1001_v25  ;;  %v1214_v55 = vmul.f32 2.0, %v1208_v9  ;;  %v1217_v51 = vmul.f32 %v1208_v9, %v1001_v25  ;;  %v1211_v37 = vmul.f32 2.0, %v1104_v41 }
  0xfa   :  { %1647 = vperm.xlu1 %1927, %v2878_v21   ;;  %v1965_v20 = vpop.eup %1964  ;;  %v267_v16 = vxor.u32 2147483648, %v1963_v58  ;;  %v1479_v9 = vadd.f32 %v2869_v50, %v1464_v45 }
  0xfb   :  { %v264_v56 = vxor.u32 2147483648, %v1965_v20  ;;  %v2968_v6 = vrot.slane %v1216_v31, %v3250_v1  ;;  %v2971_v22 = vrot.slane %v1217_v51, %v3250_v1  ;;  %v1212_v49 = vmul.f32 %v1211_v37, %v1104_v41  ;;  %v1357_v33 = vpop.permute.xlu1 %1356 }
  0xfc   :  { %v268_v62 = vsel %vm266_vm1, %v267_v16, %v1965_v20  ;;  %v578_v13 = vsel %vm576_vm2, %v267_v16, %v1965_v20  ;;  %v1215_v39 = vmul.f32 %v1214_v55, %v1104_v41  ;;  %v3251_v55 = vmov 29  }
  0xfd   :  { %v265_v2 = vsel %vm263_vm0, %v1963_v58, %v264_v56  ;;  %v575_v53 = vsel %vm573_vm4, %v1963_v58, %v264_v56  ;;  %v1353_v42 = vmul.f32 %v2968_v6, %v2703_v4  ;;  %v1387_v25 = vmul.f32 %v2971_v22, %v2761_v60  ;;  %v1553_v60 = vpop.permute.xlu0 %1552 }
  0xfe   :  { %1651 = vperm.xlu1 %1927, %v2906_v0   ;;  %v269_v27 = vsel %vm262_vm14, %v265_v2, %v268_v62  ;;  %v579_v54 = vsel %vm572_vm7, %v575_v53, %v578_v13  ;;  %v1807_v11 = vadd.f32 -1.0, %v1212_v49  ;;  %v1219_v15 = vmul.f32 %v1215_v39, %v1210_v14 }
  0xff   :  { %v270_v29 = vsel %vm259_vm11, nan, %v269_v27  ;;  %v580_v41 = vsel %vm259_vm11, nan, %v579_v54  ;;  %v1368_v4 = vadd.f32 %v2730_v63, %v1353_v42  ;;  %v1334_v51 = vadd.f32 %v1331_v5, %v1316_v24  ;;  %v1365_v63 = vpop.permute.xlu1 %1364 }
 0x100   :  { %v736_v58 = vmul.f32 %v2749_v28, %v270_v29  ;;  %v790_v38 = vmul.f32 %v2775_v26, %v580_v41  ;;  %v1218_v31 = vmul.f32 %v1807_v11, %v1210_v14  ;;  %v3001_v8 = vrot.slane %v1219_v15, %v3250_v1  ;;  %v1969_v11 = vld [vmem:[%s3134_s1 + $0x10] sm:$0x3] }
 0x101   :  { %v1512_v12 = vmul.f32 %v2922_v10, %v2968_v6  ;;  %v1390_v50 = vadd.f32 %v1387_v25, %v1368_v4  ;;  %v1542_v26 = vmul.f32 %v1535_v19, %v2971_v22  ;;  %v1497_v20 = vadd.f32 %v1494_v36, %v1479_v9 }
 0x102   :  { %1929 = vset.pattern.permute.xlu1 %v3251_v55  ;;  %v3007_v37 = vadd.f32 %v790_v38, %v736_v58  ;;  %v3010_v28 = vrot.slane %v1218_v31, %v3250_v1  ;;  %v1431_v10 = vmul.f32 %v3001_v8, %v2815_v3  ;;  %v1571_v5 = vpop.permute.xlu0 %1570  ;;  %v3252_v13 = vmov 31  }
 0x103   :  { %1662 = vperm.xlu1 %1929, %v2878_v21   ;;  %v1527_v16 = vadd.f32 %v2945_v59, %v1512_v12  ;;  %v1578_v1 = vmul.f32 %v1571_v5, %v3001_v8  ;;  %v1300_v42 = vmul.f32 %v2793_v61, %v3222_v43  ;;  %v1330_v25 = vmul.f32 %v2892_v35, %v3227_v47 }
 0x104   :  { %v1277_v14 = vmul.f32 %v1274_v44, %v3007_v37  ;;  %v1409_v24 = vmul.f32 %v3010_v28, %v2781_v23  ;;  %v1560_v56 = vmul.f32 %v1553_v60, %v3010_v28  ;;  %v1437_v19 = vmul.f32 %v1334_v51, %v3007_v37  ;;  %v1372_v49 = vpop.permute.xlu1 %1371 }
 0x105   :  { %v1545_v45 = vadd.f32 %v1542_v26, %v1527_v16  ;;  %v1584_v44 = vmul.f32 %v1497_v20, %v3007_v37  ;;  %v1352_v27 = vmul.f32 %v2968_v6, %v2939_v17  ;;  %v1386_v54 = vmul.f32 %v2971_v22, %v1372_v49 }
 0x106   :  { %1280 = vst [vmem:[#allocation2 + $0x8] sm:$0xff] %v1277_v14  ;;  %v1412_v59 = vadd.f32 %v1409_v24, %v1390_v50  ;;  %v1315_v15 = vadd.f32 %v2846_v46, %v1300_v42  ;;  %v1302_v35 = vmul.f32 %v2819_v57, %v3222_v43  ;;  %v1332_v17 = vmul.f32 %v2913_v40, %v3227_v47 }
 0x107   :  { %1666 = vperm.xlu1 %1929, %v2906_v0   ;;  %v1563_v62 = vadd.f32 %v1560_v56, %v1545_v45  ;;  %v1367_v29 = vadd.f32 %v1357_v33, %v1352_v27  ;;  %v1354_v41 = vmul.f32 %v2968_v6, %v2961_v30  ;;  %v3253_v60 = vmov 28  }
 0x108   :  { %v1434_v23 = vadd.f32 %v1431_v10, %v1412_v59  ;;  %v1380_v36 = vpop.permute.xlu1 %1379  ;;  %v1317_v46 = vadd.f32 %v2867_v7, %v1302_v35 }
 0x109   :  { %v1581_v3 = vadd.f32 %v1578_v1, %v1563_v62  ;;  %v1389_v4 = vadd.f32 %v1386_v54, %v1367_v29  ;;  %v1388_v9 = vmul.f32 %v2971_v22, %v1380_v36  ;;  %v1369_v58 = vadd.f32 %v1365_v63, %v1354_v41 }
 0x10a   :  { %v1440_v39 = vmul.f32 %v1437_v19, %v1434_v23  ;;  %v1335_v55 = vadd.f32 %v1332_v17, %v1317_v46 }
 0x10b   :  { %1931 = vset.pattern.permute.xlu1 %v3252_v13  ;;  %v1587_v2 = vmul.f32 %v1584_v44, %v1581_v3  ;;  %v1391_v30 = vadd.f32 %v1388_v9, %v1369_v58 }
 0x10c   :  { %1677 = vperm.xlu1 %1931, %v2878_v21   ;;  %1443 = vst [vmem:[%s3136_s3 + $0x8] sm:$0xff] %v1440_v39  ;;  %v1438_v20 = vmul.f32 %v1335_v55, %v2824_v48 }
 0x10d   :  { %1590 = vst [vmem:[%s3137_s4 + $0x8] sm:$0xff] %v1587_v2  ;;  %v1394_v53 = vpop.permute.xlu1 %1393 }
 0x10e   :  { %v1408_v61 = vmul.f32 %v3010_v28, %v1394_v53 }
 0x110   :  { %1681 = vperm.xlu1 %1931, %v2906_v0   ;;  %v1411_v38 = vadd.f32 %v1408_v61, %v1389_v4 }
 0x111   :  { %v1402_v0 = vpop.permute.xlu1 %1401 }
 0x112   :  { %v1410_v57 = vmul.f32 %v3010_v28, %v1402_v0 }
 0x114   :  { %1933 = vset.pattern.permute.xlu1 %v3247_v32  ;;  %v1333_v32 = vadd.f32 %v1330_v25, %v1315_v15  ;;  %v1413_v50 = vadd.f32 %v1410_v57, %v1391_v30 }
 0x115   :  { %1622 = vperm.xlu1 %1933, %v1969_v11  }
 0x116   :  { %v1416_v33 = vpop.permute.xlu1 %1415  ;;  %v1436_v40 = vmul.f32 %v1333_v32, %v2855_v18 }
 0x117   :  { %v1430_v31 = vmul.f32 %v3001_v8, %v1416_v33 }
 0x119   :  { %1934 = vset.pattern.permute.xlu1 %v3253_v60  ;;  %v1433_v51 = vadd.f32 %v1430_v31, %v1411_v38 }
 0x11a   :  { %1629 = vperm.xlu1 %1934, %v2878_v21   ;;  %v1424_v12 = vpop.permute.xlu1 %1423 }
 0x11b   :  { %v1439_v26 = vmul.f32 %v1436_v40, %v1433_v51  ;;  %v1432_v7 = vmul.f32 %v3001_v8, %v1424_v12 }
 0x11d   :  { %1442 = vst [vmem:[%s3136_s3] sm:$0xff] %v1439_v26  ;;  %v1435_v63 = vadd.f32 %v1432_v7, %v1413_v50 }
 0x11e   :  { %1637 = vperm.xlu1 %1934, %v1969_v11  }
 0x11f   :  { %v1441_v16 = vmul.f32 %v1438_v20, %v1435_v63  ;;  %v1451_v14 = vpop.permute.xlu1 %1450 }
 0x121   :  { %1444 = vst [vmem:[%s3136_s3 + $0x10] sm:$0x3] %v1441_v16 }
 0x122   :  { %1936 = vset.pattern.permute.xlu1 %v2032_v52 }
 0x123   :  { %1695 = vperm.xlu1 %1936, %v2878_v21   ;;  %v1461_v24 = vpop.permute.xlu1 %1460 }
 0x127   :  { %1703 = vperm.xlu1 %1936, %v1969_v11  }
 0x128   :  { %v1468_v10 = vpop.permute.xlu1 %1467 }
 0x12b   :  { %1938 = vset.pattern.permute.xlu1 %v2033_v34 }
 0x12c   :  { %1713 = vperm.xlu1 %1938, %v2878_v21   ;;  %v1476_v5 = vpop.permute.xlu1 %1475 }
 0x130   :  { %1721 = vperm.xlu1 %1938, %v1969_v11  }
 0x131   :  { %v1483_v45 = vpop.permute.xlu1 %1482 }
 0x135   :  { %v1491_v52 = vpop.permute.xlu1 %1490 }
 0x136   :  { %1981 = shalt.err (!%p1978_p4)
}
 0x137   :  { %s1982_s6 = scalar_lea.hbm %s3135_s2, 384 }
 0x138   :  { %p1983_p5 = scmp.ne.s32.totalorder %s3135_s2, %s1982_s6  ;;  %p1986_p6 = scmp.lt.u32.totalorder %s1982_s6, %s3135_s2 }
 0x13a   :  { %p1988_p7 = pnand %p1986_p6, %p1983_p5 }
 0x13c   :  { %1991 = shalt.err (!%p1988_p7)
}
 0x13d   :  { %s2035_s11 = smov 128   ;;  %s2036_s12 = smov 8   ;;  %v1501_v21 = vpop.permute.xlu1 %1500  ;;  %v1463_v44 = vmul.f32 %v1451_v14, %v3222_v43  ;;  %v1493_v62 = vmul.f32 %v1483_v45, %v3227_v47  ;;  %v1465_v53 = vmul.f32 %v1461_v24, %v3222_v43  ;;  %v1495_v25 = vmul.f32 %v1491_v52, %v3227_v47  ;;  %v1603_v46 = vpop.permute.xlu0 %1602 }
 0x13e   :  { %1750 = dma.vmem_to_hbm [thread:$0]  %s1745_s28, 384, %s3135_s2, [#allocation3], %s2035_s11, %s2035_s11, %s2036_s12   ;;  %v1511_v23 = vmul.f32 %v1501_v21, %v2968_v6 }
 0x13f   :  { %v1478_v39 = vadd.f32 %v1468_v10, %v1463_v44  ;;  %v1480_v0 = vadd.f32 %v1476_v5, %v1465_v53  ;;  %v1611_v5 = vmul.f32 %v1603_v46, %v3222_v43 }
 0x141   :  { %v1509_v34 = vpop.permute.xlu1 %1508  ;;  %v1496_v42 = vadd.f32 %v1493_v62, %v1478_v39  ;;  %v1498_v41 = vadd.f32 %v1495_v25, %v1480_v0  ;;  %v1619_v30 = vpop.permute.xlu0 %1618 }
 0x142   :  { %v1513_v27 = vmul.f32 %v1509_v34, %v2968_v6  ;;  %v1626_v52 = vadd.f32 %v1619_v30, %v1611_v5 }
 0x143   :  { %v1583_v17 = vmul.f32 %v1496_v42, %v2855_v18  ;;  %v1585_v57 = vmul.f32 %v1498_v41, %v2824_v48 }
 0x145   :  { %v1516_v56 = vpop.permute.xlu1 %1515  ;;  %v1656_v12 = vpop.permute.xlu0 %1655 }
 0x146   :  { %v1526_v36 = vadd.f32 %v1516_v56, %v1511_v23 }
 0x149   :  { %v1524_v1 = vpop.permute.xlu1 %1523  ;;  %v1671_v26 = vpop.permute.xlu0 %1670 }
 0x14a   :  { %v1528_v29 = vadd.f32 %v1524_v1, %v1513_v27  ;;  %v1660_v27 = vmul.f32 %v1656_v12, %v2968_v6 }
 0x14d   :  { %v1686_v63 = vpop.permute.xlu0 %1685 }
 0x14e   :  { %v1531_v19 = vpop.permute.xlu1 %1530 }
 0x14f   :  { %v1541_v13 = vmul.f32 %v1531_v19, %v2971_v22 }
 0x151   :  { %v1544_v54 = vadd.f32 %v1541_v13, %v1526_v36  ;;  %v1634_v14 = vpop.permute.xlu0 %1633 }
 0x152   :  { %v1539_v59 = vpop.permute.xlu1 %1538  ;;  %v1641_v21 = vmul.f32 %v1634_v14, %v3227_v47 }
 0x153   :  { %v1543_v11 = vmul.f32 %v1539_v59, %v2971_v22 }
 0x154   :  { %v1644_v44 = vadd.f32 %v1641_v21, %v1626_v52 }
 0x155   :  { %v1546_v4 = vadd.f32 %v1543_v11, %v1528_v29 }
 0x156   :  { %v1731_v39 = vmul.f32 %v1644_v44, %v3007_v37 }
 0x158   :  { %v1549_v49 = vpop.permute.xlu1 %1548 }
 0x159   :  { %v1559_v2 = vmul.f32 %v1549_v49, %v3010_v28 }
 0x15b   :  { %v1562_v61 = vadd.f32 %v1559_v2, %v1544_v54 }
 0x15c   :  { %v1557_v3 = vpop.permute.xlu1 %1556 }
 0x15d   :  { %v1561_v35 = vmul.f32 %v1557_v3, %v3010_v28 }
 0x15f   :  { %v1564_v33 = vadd.f32 %v1561_v35, %v1546_v4 }
 0x162   :  { %v1567_v15 = vpop.permute.xlu1 %1566 }
 0x163   :  { %v1577_v32 = vmul.f32 %v1567_v15, %v3001_v8 }
 0x165   :  { %v1580_v9 = vadd.f32 %v1577_v32, %v1562_v61  ;;  %v1675_v32 = vadd.f32 %v1671_v26, %v1660_v27 }
 0x166   :  { %v1575_v60 = vpop.permute.xlu1 %1574 }
 0x167   :  { %v1586_v58 = vmul.f32 %v1583_v17, %v1580_v9  ;;  %v1579_v38 = vmul.f32 %v1575_v60, %v3001_v8  ;;  %v1690_v17 = vmul.f32 %v1686_v63, %v2971_v22 }
 0x169   :  { %1589 = vst [vmem:[%s3137_s4] sm:$0xff] %v1586_v58  ;;  %v1582_v31 = vadd.f32 %v1579_v38, %v1564_v33 }
 0x16b   :  { %v1588_v40 = vmul.f32 %v1585_v57, %v1582_v31  ;;  %v1598_v55 = vpop.permute.xlu1 %1597  ;;  %v1700_v10 = vpop.permute.xlu0 %1699  ;;  %v1693_v57 = vadd.f32 %v1690_v17, %v1675_v32 }
 0x16c   :  { %v1707_v49 = vmul.f32 %v1700_v10, %v3010_v28  ;;  %v1610_v54 = vmul.f32 %v1598_v55, %v3222_v43 }
 0x16d   :  { %1591 = vst [vmem:[%s3137_s4 + $0x10] sm:$0x3] %v1588_v40 }
 0x16f   :  { %v1608_v51 = vpop.permute.xlu1 %1607 }
 0x170   :  { %v1718_v1 = vpop.permute.xlu0 %1717  ;;  %v1612_v41 = vmul.f32 %v1608_v51, %v3222_v43 }
 0x171   :  { %v1725_v23 = vmul.f32 %v1718_v1, %v3001_v8 }
 0x174   :  { %v1615_v50 = vpop.permute.xlu1 %1614 }
 0x175   :  { %v1625_v29 = vadd.f32 %v1615_v50, %v1610_v54 }
 0x179   :  { %v1648_v7 = vpop.permute.xlu1 %1647 }
 0x17a   :  { %v1658_v11 = vmul.f32 %v1648_v7, %v2968_v6 }
 0x17d   :  { %v1652_v20 = vpop.permute.xlu1 %1651 }
 0x17e   :  { %v1659_v34 = vmul.f32 %v1652_v20, %v2968_v6 }
 0x182   :  { %v1663_v16 = vpop.permute.xlu1 %1662 }
 0x183   :  { %v1673_v61 = vadd.f32 %v1663_v16, %v1658_v11 }
 0x186   :  { %v1667_v24 = vpop.permute.xlu1 %1666 }
 0x187   :  { %v1674_v19 = vadd.f32 %v1667_v24, %v1659_v34 }
 0x18b   :  { %v1678_v45 = vpop.permute.xlu1 %1677 }
 0x18c   :  { %v1688_v0 = vmul.f32 %v1678_v45, %v2971_v22 }
 0x18e   :  { %v1691_v4 = vadd.f32 %v1688_v0, %v1673_v61 }
 0x18f   :  { %v1682_v56 = vpop.permute.xlu1 %1681 }
 0x190   :  { %v1689_v59 = vmul.f32 %v1682_v56, %v2971_v22 }
 0x192   :  { %v1692_v62 = vadd.f32 %v1689_v59, %v1674_v19 }
 0x194   :  { %v1710_v13 = vadd.f32 %v1707_v49, %v1692_v62  ;;  %v1623_v3 = vpop.permute.xlu1 %1622 }
 0x195   :  { %v1627_v6 = vadd.f32 %v1623_v3, %v1612_v41 }
 0x196   :  { %v1728_v36 = vadd.f32 %v1725_v23, %v1710_v13 }
 0x198   :  { %v1734_v2 = vmul.f32 %v1731_v39, %v1728_v36 }
 0x199   :  { %v1630_v53 = vpop.permute.xlu1 %1629 }
 0x19a   :  { %1737 = vst [vmem:[%s3138_s5 + $0x8] sm:$0xff] %v1734_v2  ;;  %v1640_v15 = vmul.f32 %v1630_v53, %v3227_v47 }
 0x19c   :  { %v1643_v9 = vadd.f32 %v1640_v15, %v1625_v29 }
 0x19d   :  { %v1638_v42 = vpop.permute.xlu1 %1637 }
 0x19e   :  { %v1642_v60 = vmul.f32 %v1638_v42, %v3227_v47  ;;  %v1730_v31 = vmul.f32 %v1643_v9, %v2855_v18 }
 0x1a0   :  { %v1645_v40 = vadd.f32 %v1642_v60, %v1627_v6 }
 0x1a2   :  { %v1696_v25 = vpop.permute.xlu1 %1695  ;;  %v1732_v51 = vmul.f32 %v1645_v40, %v2824_v48 }
 0x1a3   :  { %v1706_v35 = vmul.f32 %v1696_v25, %v3010_v28 }
 0x1a5   :  { %v1709_v33 = vadd.f32 %v1706_v35, %v1691_v4 }
 0x1a6   :  { %v1704_v37 = vpop.permute.xlu1 %1703 }
 0x1a7   :  { %v1708_v58 = vmul.f32 %v1704_v37, %v3010_v28 }
 0x1a9   :  { %v1711_v22 = vadd.f32 %v1708_v58, %v1693_v57 }
 0x1ab   :  { %v1714_v46 = vpop.permute.xlu1 %1713 }
 0x1ac   :  { %v1724_v38 = vmul.f32 %v1714_v46, %v3001_v8 }
 0x1ae   :  { %v1727_v55 = vadd.f32 %v1724_v38, %v1709_v33 }
 0x1af   :  { %v1722_v30 = vpop.permute.xlu1 %1721 }
 0x1b0   :  { %v1733_v12 = vmul.f32 %v1730_v31, %v1727_v55  ;;  %v1726_v43 = vmul.f32 %v1722_v30, %v3001_v8 }
 0x1b2   :  { %1736 = vst [vmem:[%s3138_s5] sm:$0xff] %v1733_v12  ;;  %v1729_v47 = vadd.f32 %v1726_v43, %v1711_v22 }
 0x1b4   :  { %v1735_v28 = vmul.f32 %v1732_v51, %v1729_v47 }
 0x1b6   :  { %1738 = vst [vmem:[%s3138_s5 + $0x10] sm:$0x3] %v1735_v28 }
 0x1b7   :  { %1992 = dma.done.wait [#allocation3], 384  }
 0x1b8   :  { %1993 = vsyncadd [#allocation3], 4294966912 }
 0x1b9   :  { %1766 = vsyncpa [#allocation3], 1 }

</bundles_post_ra>
